<compile_context>
chip_gen: v7x
topology: tpu7x:2x2x1
jax: 0.10.0
libtpu: 0.0.40
codegen_flags: <defaults>
</compile_context>

<pallas_src>
import math
import numpy as np
import jax
import jax.numpy as jnp
from jax.experimental import pallas as pl
from jax.experimental.pallas import tpu as pltpu

# ---- small, module-consistent sizes ----
INPUT_SIZE = 16
HIDDEN_SIZE = 32          # 4*H = 128 -> one gate slab is exactly one lane-width
NUM_STRIPES = 4
NUM_LAYERS = 2
BATCH = 8
SEQ_LEN = 8
STRIPE = HIDDEN_SIZE // NUM_STRIPES


# ------------------------------ Pallas kernel ------------------------------

def _fused_striped_lstm_kernel(x_ref, wx0_ref, b0_ref, wf_ref, b1_ref,
                               out_ref, hc_ref):
    """Whole 2-layer StripedLSTM forward, zero initial state.

    Shapes (static):
      x_ref:   (T*B, In)         out_ref: (B, T*H)   lane-dense layer-1 output
      wx0_ref: (In, 4H)          hc_ref:  (B, 4H)    packed [h0|c0|h1|c1] finals
      b0_ref:  (1, 4H)
      wf_ref:  (2H, 8H)   fused  [[Wh0, Wx1], [0, Wh1]]
      b1_ref:  (1, 4H)
    All i/f/o gate columns of the weights/biases are pre-scaled by 0.5.
    """
    B, TH = out_ref.shape
    H4 = wx0_ref.shape[1]
    H = H4 // 4
    T = TH // H

    # Per-lane scale/offset turning one full-slab tanh into [sig|sig|tanh|sig]:
    # sigmoid(x) = 0.5*tanh(x/2) + 0.5, the /2 is already folded into weights.
    lane = jax.lax.broadcasted_iota(jnp.int32, (1, H4), 1)
    is_g = jnp.logical_and(lane >= 2 * H, lane < 3 * H)
    g_scale = jnp.where(is_g, 1.0, 0.5).astype(jnp.float32)
    g_off = jnp.where(is_g, 0.0, 0.5).astype(jnp.float32)

    def cell(gates, c):
        # ONE full-vreg tanh over the whole (B, 4H) slab, then VPU fma.
        a = jnp.tanh(gates) * g_scale + g_off
        i_g = a[:, 0 * H:1 * H]
        f_g = a[:, 1 * H:2 * H]
        g_g = a[:, 2 * H:3 * H]
        o_g = a[:, 3 * H:4 * H]
        c_new = f_g * c + i_g * g_g
        h_new = o_g * jnp.tanh(c_new)
        return h_new, c_new

    # Hoisted layer-0 input projection (+bias): one (T*B,In)@(In,4H) MXU matmul,
    # kept live as a value (8 vregs) -- no scratch round-trip.
    gx0 = (jnp.dot(x_ref[...], wx0_ref[...],
                   preferred_element_type=jnp.float32) + b0_ref[...])

    wf = wf_ref[...]      # (2H, 8H)
    b1 = b1_ref[...]      # (1, 4H)

    zero = jnp.zeros((B, H), jnp.float32)

    # Leading wavefront step: layer-0 t=0 only (h0_{-1}=0 -> no recurrent term).
    h0, c0 = cell(gx0[0:B, :], zero)
    h1, c1 = zero, zero
    outs = []

    # Wavefront w = 1..T-1: layer-0 step w fused with layer-1 step w-1.
    # Single MXU push per step: [h0_{w-1} | h1_{w-2}] @ [[Wh0, Wx1],[0, Wh1]].
    for w in range(1, T):
        lhs = jnp.concatenate([h0, h1], axis=1)                      # (B, 2H)
        res = jnp.dot(lhs, wf, preferred_element_type=jnp.float32)   # (B, 8H)
        gates1 = res[:, H4:] + b1                 # layer-1, t = w-1
        h1, c1 = cell(gates1, c1)
        outs.append(h1)
        gates0 = gx0[w * B:(w + 1) * B, :] + res[:, :H4]   # layer-0, t = w
        h0, c0 = cell(gates0, c0)

    # Trailing wavefront step: layer-1, t = T-1.
    lhs = jnp.concatenate([h0, h1], axis=1)
    res = jnp.dot(lhs, wf, preferred_element_type=jnp.float32)
    h1, c1 = cell(res[:, H4:] + b1, c1)
    outs.append(h1)

    # Single lane-dense writeback of all layer-1 outputs: (B, T*H).
    out_ref[...] = jnp.concatenate(outs, axis=1)
    # Final states packed into one lane-dense (B, 4H) slab: [h0 | c0 | h1 | c1].
    hc_ref[...] = jnp.concatenate([h0, c0, h1, c1], axis=1)


# ------------------------------ host wrapper ------------------------------

def striped_lstm_forward(x, dense_params):
    """x: (T, B, In).  dense_params: [(Wx, Wh, bias)] per layer, gate columns
    ordered [i|f|g|o] (stripe-major within each gate), Wh block-diagonal.
    Returns (output (T,B,H), (h_n, c_n)) like the PyTorch module with zero
    initial hidden state."""
    T, B, In = x.shape
    (wx0, wh0, b0), (wx1, wh1, b1) = dense_params
    H = wh0.shape[0]
    H4 = 4 * H

    # Fold the sigmoid-via-tanh pre-scale (exactly 0.5) into i/f/o columns.
    col_scale = jnp.concatenate(
        [jnp.full((1, H), 0.5), jnp.full((1, H), 0.5),
         jnp.ones((1, H)), jnp.full((1, H), 0.5)], axis=1).astype(jnp.float32)
    wx0_s, wh0_s, b0_s = wx0 * col_scale, wh0 * col_scale, b0 * col_scale
    wx1_s, wh1_s, b1_s = wx1 * col_scale, wh1 * col_scale, b1 * col_scale

    # Block RHS for the fused wavefront matmul: [h0 | h1] @ [[Wh0, Wx1],[0, Wh1]].
    wfused = jnp.concatenate(
        [jnp.concatenate([wh0_s, wx1_s], axis=1),
         jnp.concatenate([jnp.zeros((H, H4), jnp.float32), wh1_s], axis=1)],
        axis=0)                                                    # (2H, 8H)

    x2d = x.reshape(T * B, In).astype(jnp.float32)

    # TODO(synk): at larger T/B, tile T over an 'arbitrary' grid axis (carry
    # h/c in scratch) and add a 'parallel' batch axis for v7x's 2 TensorCores;
    # at these sizes everything is resident and latency-bound.
    out_ld, hc = pl.pallas_call(
        _fused_striped_lstm_kernel,
        out_shape=(jax.ShapeDtypeStruct((B, T * H), jnp.float32),
                   jax.ShapeDtypeStruct((B, 4 * H), jnp.float32)),
        grid_spec=pltpu.PrefetchScalarGridSpec(
            num_scalar_prefetch=0,
            grid=(1,),                       # single step: everything resident
            in_specs=[
                pl.BlockSpec((T * B, In), lambda i: (0, 0)),
                pl.BlockSpec((In, H4), lambda i: (0, 0)),
                pl.BlockSpec((1, H4), lambda i: (0, 0)),
                pl.BlockSpec((2 * H, 2 * H4), lambda i: (0, 0)),
                pl.BlockSpec((1, H4), lambda i: (0, 0)),
            ],
            out_specs=[
                pl.BlockSpec((B, T * H), lambda i: (0, 0)),
                pl.BlockSpec((B, 4 * H), lambda i: (0, 0)),
            ],
        ),
        compiler_params=pltpu.CompilerParams(
            dimension_semantics=("arbitrary",)),
    )(x2d, wx0_s, b0_s, wfused, b1_s)

    # Undo lane-dense layouts (cheap wrapper-side reshapes).
    output = jnp.transpose(out_ld.reshape(B, T, H), (1, 0, 2))
    h_n = jnp.stack([hc[:, 0:H], hc[:, 2 * H:3 * H]])
    c_n = jnp.stack([hc[:, H:2 * H], hc[:, 3 * H:4 * H]])
    return output, (h_n, c_n)


# ------------------------- parameter construction -------------------------

def init_striped_cell_raw(key, input_size, hidden_size, num_stripes):
    """Per-stripe parameters mimicking the PyTorch reset_parameters scheme.
    Returns (w_ih (ns,4S,In), w_hh (ns,4S,S), b_ih (ns,4S), b_hh (ns,4S)).
    Per reset_parameters BOTH biases use the bound from weight_ih's fan_in."""
    S = hidden_size // num_stripes
    keys = jax.random.split(key, 4 * num_stripes)
    bound_ih = 1.0 / math.sqrt(input_size)   # kaiming_uniform(a=sqrt(5)) bound
    bound_hh = 1.0 / math.sqrt(S)
    w_ih, w_hh, b_ih, b_hh = [], [], [], []
    for i in range(num_stripes):
        w_ih.append(jax.random.uniform(keys[4 * i + 0], (4 * S, input_size),
                                       minval=-bound_ih, maxval=bound_ih))
        w_hh.append(jax.random.uniform(keys[4 * i + 1], (4 * S, S),
                                       minval=-bound_hh, maxval=bound_hh))
        b_ih.append(jax.random.uniform(keys[4 * i + 2], (4 * S,),
                                       minval=-bound_ih, maxval=bound_ih))
        b_hh.append(jax.random.uniform(keys[4 * i + 3], (4 * S,),
                                       minval=-bound_ih, maxval=bound_ih))
    return (jnp.stack(w_ih).astype(jnp.float32),
            jnp.stack(w_hh).astype(jnp.float32),
            jnp.stack(b_ih).astype(jnp.float32),
            jnp.stack(b_hh).astype(jnp.float32))


def assemble_dense_params(raw, input_size, hidden_size, num_stripes):
    """Dense (Wx (In,4H), Wh (H,4H), bias (1,4H)) equivalent to the striped
    cell: gate columns [i|f|g|o], stripe-major within each gate, Wh
    block-diagonal over stripes inside each gate block."""
    w_ih, w_hh, b_ih, b_hh = raw
    S = hidden_size // num_stripes
    Wx = jnp.transpose(w_ih.reshape(num_stripes, 4, S, input_size),
                       (1, 0, 2, 3)).reshape(4 * hidden_size, input_size).T
    Wh = jnp.zeros((hidden_size, 4 * hidden_size), jnp.float32)
    w_hh_r = w_hh.reshape(num_stripes, 4, S, S)   # (stripe, gate, out_S, in_S)
    for i in range(num_stripes):
        for g in range(4):
            Wh = Wh.at[i * S:(i + 1) * S,
                       g * hidden_size + i * S:g * hidden_size + (i + 1) * S
                       ].set(w_hh_r[i, g].T)
    b = (b_ih + b_hh).reshape(num_stripes, 4, S)
    bias = jnp.transpose(b, (1, 0, 2)).reshape(1, 4 * hidden_size)
    return (Wx.astype(jnp.float32), Wh.astype(jnp.float32),
            bias.astype(jnp.float32))


# --------------- pure-JAX reference mirroring the PyTorch cell ---------------

def _ref_striped_cell_step(x_t, h, c, raw, S):
    w_ih, w_hh, b_ih, b_hh = raw
    ns = w_ih.shape[0]
    h_out, c_out = [], []
    for i in range(ns):
        h_s = h[:, i * S:(i + 1) * S]
        c_s = c[:, i * S:(i + 1) * S]
        gates = x_t @ w_ih[i].T + b_ih[i] + h_s @ w_hh[i].T + b_hh[i]
        ig, fg, gg, og = jnp.split(gates, 4, axis=1)
        ig, fg, og = jax.nn.sigmoid(ig), jax.nn.sigmoid(fg), jax.nn.sigmoid(og)
        gg = jnp.tanh(gg)
        c_new = fg * c_s + ig * gg
        h_out.append(og * jnp.tanh(c_new))
        c_out.append(c_new)
    return jnp.concatenate(h_out, axis=1), jnp.concatenate(c_out, axis=1)


def ref_striped_lstm(x, raw_layers, hidden_size, num_stripes):
    T, B, _ = x.shape
    S = hidden_size // num_stripes
    inp = x
    h_n, c_n = [], []
    for raw in raw_layers:
        h = jnp.zeros((B, hidden_size), jnp.float32)
        c = jnp.zeros((B, hidden_size), jnp.float32)
        outs = []
        for t in range(T):
            h, c = _ref_striped_cell_step(inp[t], h, c, raw, S)
            outs.append(h)
        inp = jnp.stack(outs)
        h_n.append(h)
        c_n.append(c)
    return inp, jnp.stack(h_n), jnp.stack(c_n)


if __name__ == "__main__":
    # TODO(synk): PackedSequence input path and inter-layer dropout (dropout=0
    # default) are not translated; only the standard dense, zero-init-hidden
    # forward is implemented.
    root = jax.random.PRNGKey(0)
    k_x, k_l0, k_l1 = jax.random.split(root, 3)

    # input: (seq_len, batch, input_size)
    x = jax.random.normal(k_x, (SEQ_LEN, BATCH, INPUT_SIZE), dtype=jnp.float32)

    raw_layers = [
        init_striped_cell_raw(k_l0, INPUT_SIZE, HIDDEN_SIZE, NUM_STRIPES),
        init_striped_cell_raw(k_l1, HIDDEN_SIZE, HIDDEN_SIZE, NUM_STRIPES),
    ]
    dense_params = [
        assemble_dense_params(raw_layers[0], INPUT_SIZE, HIDDEN_SIZE, NUM_STRIPES),
        assemble_dense_params(raw_layers[1], HIDDEN_SIZE, HIDDEN_SIZE, NUM_STRIPES),
    ]

    output, (h_n, c_n) = striped_lstm_forward(x, dense_params)
    jax.block_until_ready((output, h_n, c_n))

    # Correctness vs a reference that mirrors the PyTorch per-stripe cell
    # exactly (also validates the dense/block-diagonal weight assembly).
    ref_out, ref_h, ref_c = ref_striped_lstm(x, raw_layers, HIDDEN_SIZE,
                                             NUM_STRIPES)
    np.testing.assert_allclose(np.asarray(output), np.asarray(ref_out),
                               rtol=1e-4, atol=2e-5)
    np.testing.assert_allclose(np.asarray(h_n), np.asarray(ref_h),
                               rtol=1e-4, atol=2e-5)
    np.testing.assert_allclose(np.asarray(c_n), np.asarray(ref_c),
                               rtol=1e-4, atol=2e-5)

    assert output.shape == (SEQ_LEN, BATCH, HIDDEN_SIZE)
    assert h_n.shape == (NUM_LAYERS, BATCH, HIDDEN_SIZE)
    assert c_n.shape == (NUM_LAYERS, BATCH, HIDDEN_SIZE)
    print("KERNEL_OK")
</pallas_src>

<mosaic_0001>
module attributes {stable_mosaic.version = 11 : i64} {
  func.func @_fused_striped_lstm_kernel(%arg0: i32, %arg1: memref<64x16xf32, #tpu.memory_space<vmem>>, %arg2: memref<16x128xf32, #tpu.memory_space<vmem>>, %arg3: memref<1x128xf32, #tpu.memory_space<vmem>>, %arg4: memref<64x256xf32, #tpu.memory_space<vmem>>, %arg5: memref<1x128xf32, #tpu.memory_space<vmem>>, %arg6: memref<8x256xf32, #tpu.memory_space<vmem>>, %arg7: memref<8x128xf32, #tpu.memory_space<vmem>>) attributes {dimension_semantics = [#tpu.dimension_semantics<arbitrary>], iteration_bounds = array<i64: 1>, scalar_prefetch = 0 : i64, scratch_operands = 0 : i64, tpu.core_type = #tpu.core_type<tc>, window_params = [{pipeline_mode = #tpu.pipeline_mode<synchronous>, transform_indices = @transform_0, window_bounds = array<i64: 64, 16>}, {pipeline_mode = #tpu.pipeline_mode<synchronous>, transform_indices = @transform_1, window_bounds = array<i64: 16, 128>}, {pipeline_mode = #tpu.pipeline_mode<synchronous>, transform_indices = @transform_2, window_bounds = array<i64: 1, 128>}, {pipeline_mode = #tpu.pipeline_mode<synchronous>, transform_indices = @transform_3, window_bounds = array<i64: 64, 256>}, {pipeline_mode = #tpu.pipeline_mode<synchronous>, transform_indices = @transform_4, window_bounds = array<i64: 1, 128>}, {pipeline_mode = #tpu.pipeline_mode<synchronous>, transform_indices = @transform_5, window_bounds = array<i64: 8, 256>}, {pipeline_mode = #tpu.pipeline_mode<synchronous>, transform_indices = @transform_6, window_bounds = array<i64: 8, 128>}]} {
    %0 = tpu.iota {dimensions = array<i32: 1>} : vector<1x128xi32>
    %c64_i32 = arith.constant 64 : i32
    %1 = vector.broadcast %c64_i32 : i32 to vector<1x128xi32>
    %2 = arith.cmpi sge, %0, %1 : vector<1x128xi32>
    %c96_i32 = arith.constant 96 : i32
    %3 = vector.broadcast %c96_i32 : i32 to vector<1x128xi32>
    %4 = arith.cmpi slt, %0, %3 : vector<1x128xi32>
    %5 = arith.andi %2, %4 : vector<1x128xi1>
    %cst = arith.constant 1.000000e+00 : f32
    %cst_0 = arith.constant 5.000000e-01 : f32
    %6 = vector.broadcast %cst : f32 to vector<1x128xf32>
    %7 = vector.broadcast %cst_0 : f32 to vector<1x128xf32>
    %8 = arith.select %5, %6, %7 : vector<1x128xi1>, vector<1x128xf32>
    %cst_1 = arith.constant 0.000000e+00 : f32
    %cst_2 = arith.constant 5.000000e-01 : f32
    %9 = vector.broadcast %cst_1 : f32 to vector<1x128xf32>
    %10 = vector.broadcast %cst_2 : f32 to vector<1x128xf32>
    %11 = arith.select %5, %9, %10 : vector<1x128xi1>, vector<1x128xf32>
    %c0 = arith.constant 0 : index
    %c0_3 = arith.constant 0 : index
    %12 = vector.load %arg1[%c0, %c0_3] : memref<64x16xf32, #tpu.memory_space<vmem>>, vector<64x16xf32>
    %c0_4 = arith.constant 0 : index
    %c0_5 = arith.constant 0 : index
    %13 = vector.load %arg2[%c0_4, %c0_5] : memref<16x128xf32, #tpu.memory_space<vmem>>, vector<16x128xf32>
    %cst_6 = arith.constant dense<0.000000e+00> : vector<64x128xf32>
    %14 = tpu.matmul %12, %13, %cst_6 {dimension_numbers = #tpu.dot_dimension_numbers<[1], [0], [0], [1], [0, 0, 1, 1], [], []>} : vector<64x16xf32>, vector<16x128xf32>, vector<64x128xf32> -> vector<64x128xf32>
    %c0_7 = arith.constant 0 : index
    %c0_8 = arith.constant 0 : index
    %15 = vector.load %arg3[%c0_7, %c0_8] : memref<1x128xf32, #tpu.memory_space<vmem>>, vector<1x128xf32>
    %16 = vector.broadcast %15 : vector<1x128xf32> to vector<64x128xf32>
    %17 = arith.addf %14, %16 : vector<64x128xf32>
    %c0_9 = arith.constant 0 : index
    %c0_10 = arith.constant 0 : index
    %18 = vector.load %arg4[%c0_9, %c0_10] : memref<64x256xf32, #tpu.memory_space<vmem>>, vector<64x256xf32>
    %c0_11 = arith.constant 0 : index
    %c0_12 = arith.constant 0 : index
    %19 = vector.load %arg5[%c0_11, %c0_12] : memref<1x128xf32, #tpu.memory_space<vmem>>, vector<1x128xf32>
    %cst_13 = arith.constant 0.000000e+00 : f32
    %20 = vector.broadcast %cst_13 : f32 to vector<8x32xf32>
    %21 = vector.extract_strided_slice %17 {offsets = [0, 0], sizes = [8, 128], strides = [1, 1]} : vector<64x128xf32> to vector<8x128xf32>
    %22 = math.tanh %21 : vector<8x128xf32>
    %23 = vector.broadcast %8 : vector<1x128xf32> to vector<8x128xf32>
    %24 = arith.mulf %22, %23 : vector<8x128xf32>
    %25 = vector.broadcast %11 : vector<1x128xf32> to vector<8x128xf32>
    %26 = arith.addf %24, %25 : vector<8x128xf32>
    %27 = vector.extract_strided_slice %26 {offsets = [0, 0], sizes = [8, 32], strides = [1, 1]} : vector<8x128xf32> to vector<8x32xf32>
    %28 = vector.extract_strided_slice %26 {offsets = [0, 32], sizes = [8, 32], strides = [1, 1]} : vector<8x128xf32> to vector<8x32xf32>
    %29 = vector.extract_strided_slice %26 {offsets = [0, 64], sizes = [8, 32], strides = [1, 1]} : vector<8x128xf32> to vector<8x32xf32>
    %30 = vector.extract_strided_slice %26 {offsets = [0, 96], sizes = [8, 32], strides = [1, 1]} : vector<8x128xf32> to vector<8x32xf32>
    %31 = arith.mulf %28, %20 : vector<8x32xf32>
    %32 = arith.mulf %27, %29 : vector<8x32xf32>
    %33 = arith.addf %31, %32 : vector<8x32xf32>
    %34 = math.tanh %33 : vector<8x32xf32>
    %35 = arith.mulf %30, %34 : vector<8x32xf32>
    %36 = tpu.concatenate %35, %20 in 1 : vector<8x32xf32>, vector<8x32xf32> -> vector<8x64xf32>
    %cst_14 = arith.constant dense<0.000000e+00> : vector<8x256xf32>
    %37 = tpu.matmul %36, %18, %cst_14 {dimension_numbers = #tpu.dot_dimension_numbers<[1], [0], [0], [1], [0, 0, 1, 1], [], []>} : vector<8x64xf32>, vector<64x256xf32>, vector<8x256xf32> -> vector<8x256xf32>
    %38 = vector.extract_strided_slice %37 {offsets = [0, 128], sizes = [8, 128], strides = [1, 1]} : vector<8x256xf32> to vector<8x128xf32>
    %39 = vector.broadcast %19 : vector<1x128xf32> to vector<8x128xf32>
    %40 = arith.addf %38, %39 : vector<8x128xf32>
    %41 = math.tanh %40 : vector<8x128xf32>
    %42 = vector.broadcast %8 : vector<1x128xf32> to vector<8x128xf32>
    %43 = arith.mulf %41, %42 : vector<8x128xf32>
    %44 = vector.broadcast %11 : vector<1x128xf32> to vector<8x128xf32>
    %45 = arith.addf %43, %44 : vector<8x128xf32>
    %46 = vector.extract_strided_slice %45 {offsets = [0, 0], sizes = [8, 32], strides = [1, 1]} : vector<8x128xf32> to vector<8x32xf32>
    %47 = vector.extract_strided_slice %45 {offsets = [0, 32], sizes = [8, 32], strides = [1, 1]} : vector<8x128xf32> to vector<8x32xf32>
    %48 = vector.extract_strided_slice %45 {offsets = [0, 64], sizes = [8, 32], strides = [1, 1]} : vector<8x128xf32> to vector<8x32xf32>
    %49 = vector.extract_strided_slice %45 {offsets = [0, 96], sizes = [8, 32], strides = [1, 1]} : vector<8x128xf32> to vector<8x32xf32>
    %50 = arith.mulf %47, %20 : vector<8x32xf32>
    %51 = arith.mulf %46, %48 : vector<8x32xf32>
    %52 = arith.addf %50, %51 : vector<8x32xf32>
    %53 = math.tanh %52 : vector<8x32xf32>
    %54 = arith.mulf %49, %53 : vector<8x32xf32>
    %55 = vector.extract_strided_slice %17 {offsets = [8, 0], sizes = [8, 128], strides = [1, 1]} : vector<64x128xf32> to vector<8x128xf32>
    %56 = vector.extract_strided_slice %37 {offsets = [0, 0], sizes = [8, 128], strides = [1, 1]} : vector<8x256xf32> to vector<8x128xf32>
    %57 = arith.addf %55, %56 : vector<8x128xf32>
    %58 = math.tanh %57 : vector<8x128xf32>
    %59 = vector.broadcast %8 : vector<1x128xf32> to vector<8x128xf32>
    %60 = arith.mulf %58, %59 : vector<8x128xf32>
    %61 = vector.broadcast %11 : vector<1x128xf32> to vector<8x128xf32>
    %62 = arith.addf %60, %61 : vector<8x128xf32>
    %63 = vector.extract_strided_slice %62 {offsets = [0, 0], sizes = [8, 32], strides = [1, 1]} : vector<8x128xf32> to vector<8x32xf32>
    %64 = vector.extract_strided_slice %62 {offsets = [0, 32], sizes = [8, 32], strides = [1, 1]} : vector<8x128xf32> to vector<8x32xf32>
    %65 = vector.extract_strided_slice %62 {offsets = [0, 64], sizes = [8, 32], strides = [1, 1]} : vector<8x128xf32> to vector<8x32xf32>
    %66 = vector.extract_strided_slice %62 {offsets = [0, 96], sizes = [8, 32], strides = [1, 1]} : vector<8x128xf32> to vector<8x32xf32>
    %67 = arith.mulf %64, %33 : vector<8x32xf32>
    %68 = arith.mulf %63, %65 : vector<8x32xf32>
    %69 = arith.addf %67, %68 : vector<8x32xf32>
    %70 = math.tanh %69 : vector<8x32xf32>
    %71 = arith.mulf %66, %70 : vector<8x32xf32>
    %72 = tpu.concatenate %71, %54 in 1 : vector<8x32xf32>, vector<8x32xf32> -> vector<8x64xf32>
    %cst_15 = arith.constant dense<0.000000e+00> : vector<8x256xf32>
    %73 = tpu.matmul %72, %18, %cst_15 {dimension_numbers = #tpu.dot_dimension_numbers<[1], [0], [0], [1], [0, 0, 1, 1], [], []>} : vector<8x64xf32>, vector<64x256xf32>, vector<8x256xf32> -> vector<8x256xf32>
    %74 = vector.extract_strided_slice %73 {offsets = [0, 128], sizes = [8, 128], strides = [1, 1]} : vector<8x256xf32> to vector<8x128xf32>
    %75 = vector.broadcast %19 : vector<1x128xf32> to vector<8x128xf32>
    %76 = arith.addf %74, %75 : vector<8x128xf32>
    %77 = math.tanh %76 : vector<8x128xf32>
    %78 = vector.broadcast %8 : vector<1x128xf32> to vector<8x128xf32>
    %79 = arith.mulf %77, %78 : vector<8x128xf32>
    %80 = vector.broadcast %11 : vector<1x128xf32> to vector<8x128xf32>
    %81 = arith.addf %79, %80 : vector<8x128xf32>
    %82 = vector.extract_strided_slice %81 {offsets = [0, 0], sizes = [8, 32], strides = [1, 1]} : vector<8x128xf32> to vector<8x32xf32>
    %83 = vector.extract_strided_slice %81 {offsets = [0, 32], sizes = [8, 32], strides = [1, 1]} : vector<8x128xf32> to vector<8x32xf32>
    %84 = vector.extract_strided_slice %81 {offsets = [0, 64], sizes = [8, 32], strides = [1, 1]} : vector<8x128xf32> to vector<8x32xf32>
    %85 = vector.extract_strided_slice %81 {offsets = [0, 96], sizes = [8, 32], strides = [1, 1]} : vector<8x128xf32> to vector<8x32xf32>
    %86 = arith.mulf %83, %52 : vector<8x32xf32>
    %87 = arith.mulf %82, %84 : vector<8x32xf32>
    %88 = arith.addf %86, %87 : vector<8x32xf32>
    %89 = math.tanh %88 : vector<8x32xf32>
    %90 = arith.mulf %85, %89 : vector<8x32xf32>
    %91 = vector.extract_strided_slice %17 {offsets = [16, 0], sizes = [8, 128], strides = [1, 1]} : vector<64x128xf32> to vector<8x128xf32>
    %92 = vector.extract_strided_slice %73 {offsets = [0, 0], sizes = [8, 128], strides = [1, 1]} : vector<8x256xf32> to vector<8x128xf32>
    %93 = arith.addf %91, %92 : vector<8x128xf32>
    %94 = math.tanh %93 : vector<8x128xf32>
    %95 = vector.broadcast %8 : vector<1x128xf32> to vector<8x128xf32>
    %96 = arith.mulf %94, %95 : vector<8x128xf32>
    %97 = vector.broadcast %11 : vector<1x128xf32> to vector<8x128xf32>
    %98 = arith.addf %96, %97 : vector<8x128xf32>
    %99 = vector.extract_strided_slice %98 {offsets = [0, 0], sizes = [8, 32], strides = [1, 1]} : vector<8x128xf32> to vector<8x32xf32>
    %100 = vector.extract_strided_slice %98 {offsets = [0, 32], sizes = [8, 32], strides = [1, 1]} : vector<8x128xf32> to vector<8x32xf32>
    %101 = vector.extract_strided_slice %98 {offsets = [0, 64], sizes = [8, 32], strides = [1, 1]} : vector<8x128xf32> to vector<8x32xf32>
    %102 = vector.extract_strided_slice %98 {offsets = [0, 96], sizes = [8, 32], strides = [1, 1]} : vector<8x128xf32> to vector<8x32xf32>
    %103 = arith.mulf %100, %69 : vector<8x32xf32>
    %104 = arith.mulf %99, %101 : vector<8x32xf32>
    %105 = arith.addf %103, %104 : vector<8x32xf32>
    %106 = math.tanh %105 : vector<8x32xf32>
    %107 = arith.mulf %102, %106 : vector<8x32xf32>
    %108 = tpu.concatenate %107, %90 in 1 : vector<8x32xf32>, vector<8x32xf32> -> vector<8x64xf32>
    %cst_16 = arith.constant dense<0.000000e+00> : vector<8x256xf32>
    %109 = tpu.matmul %108, %18, %cst_16 {dimension_numbers = #tpu.dot_dimension_numbers<[1], [0], [0], [1], [0, 0, 1, 1], [], []>} : vector<8x64xf32>, vector<64x256xf32>, vector<8x256xf32> -> vector<8x256xf32>
    %110 = vector.extract_strided_slice %109 {offsets = [0, 128], sizes = [8, 128], strides = [1, 1]} : vector<8x256xf32> to vector<8x128xf32>
    %111 = vector.broadcast %19 : vector<1x128xf32> to vector<8x128xf32>
    %112 = arith.addf %110, %111 : vector<8x128xf32>
    %113 = math.tanh %112 : vector<8x128xf32>
    %114 = vector.broadcast %8 : vector<1x128xf32> to vector<8x128xf32>
    %115 = arith.mulf %113, %114 : vector<8x128xf32>
    %116 = vector.broadcast %11 : vector<1x128xf32> to vector<8x128xf32>
    %117 = arith.addf %115, %116 : vector<8x128xf32>
    %118 = vector.extract_strided_slice %117 {offsets = [0, 0], sizes = [8, 32], strides = [1, 1]} : vector<8x128xf32> to vector<8x32xf32>
    %119 = vector.extract_strided_slice %117 {offsets = [0, 32], sizes = [8, 32], strides = [1, 1]} : vector<8x128xf32> to vector<8x32xf32>
    %120 = vector.extract_strided_slice %117 {offsets = [0, 64], sizes = [8, 32], strides = [1, 1]} : vector<8x128xf32> to vector<8x32xf32>
    %121 = vector.extract_strided_slice %117 {offsets = [0, 96], sizes = [8, 32], strides = [1, 1]} : vector<8x128xf32> to vector<8x32xf32>
    %122 = arith.mulf %119, %88 : vector<8x32xf32>
    %123 = arith.mulf %118, %120 : vector<8x32xf32>
    %124 = arith.addf %122, %123 : vector<8x32xf32>
    %125 = math.tanh %124 : vector<8x32xf32>
    %126 = arith.mulf %121, %125 : vector<8x32xf32>
    %127 = vector.extract_strided_slice %17 {offsets = [24, 0], sizes = [8, 128], strides = [1, 1]} : vector<64x128xf32> to vector<8x128xf32>
    %128 = vector.extract_strided_slice %109 {offsets = [0, 0], sizes = [8, 128], strides = [1, 1]} : vector<8x256xf32> to vector<8x128xf32>
    %129 = arith.addf %127, %128 : vector<8x128xf32>
    %130 = math.tanh %129 : vector<8x128xf32>
    %131 = vector.broadcast %8 : vector<1x128xf32> to vector<8x128xf32>
    %132 = arith.mulf %130, %131 : vector<8x128xf32>
    %133 = vector.broadcast %11 : vector<1x128xf32> to vector<8x128xf32>
    %134 = arith.addf %132, %133 : vector<8x128xf32>
    %135 = vector.extract_strided_slice %134 {offsets = [0, 0], sizes = [8, 32], strides = [1, 1]} : vector<8x128xf32> to vector<8x32xf32>
    %136 = vector.extract_strided_slice %134 {offsets = [0, 32], sizes = [8, 32], strides = [1, 1]} : vector<8x128xf32> to vector<8x32xf32>
    %137 = vector.extract_strided_slice %134 {offsets = [0, 64], sizes = [8, 32], strides = [1, 1]} : vector<8x128xf32> to vector<8x32xf32>
    %138 = vector.extract_strided_slice %134 {offsets = [0, 96], sizes = [8, 32], strides = [1, 1]} : vector<8x128xf32> to vector<8x32xf32>
    %139 = arith.mulf %136, %105 : vector<8x32xf32>
    %140 = arith.mulf %135, %137 : vector<8x32xf32>
    %141 = arith.addf %139, %140 : vector<8x32xf32>
    %142 = math.tanh %141 : vector<8x32xf32>
    %143 = arith.mulf %138, %142 : vector<8x32xf32>
    %144 = tpu.concatenate %143, %126 in 1 : vector<8x32xf32>, vector<8x32xf32> -> vector<8x64xf32>
    %cst_17 = arith.constant dense<0.000000e+00> : vector<8x256xf32>
    %145 = tpu.matmul %144, %18, %cst_17 {dimension_numbers = #tpu.dot_dimension_numbers<[1], [0], [0], [1], [0, 0, 1, 1], [], []>} : vector<8x64xf32>, vector<64x256xf32>, vector<8x256xf32> -> vector<8x256xf32>
    %146 = vector.extract_strided_slice %145 {offsets = [0, 128], sizes = [8, 128], strides = [1, 1]} : vector<8x256xf32> to vector<8x128xf32>
    %147 = vector.broadcast %19 : vector<1x128xf32> to vector<8x128xf32>
    %148 = arith.addf %146, %147 : vector<8x128xf32>
    %149 = math.tanh %148 : vector<8x128xf32>
    %150 = vector.broadcast %8 : vector<1x128xf32> to vector<8x128xf32>
    %151 = arith.mulf %149, %150 : vector<8x128xf32>
    %152 = vector.broadcast %11 : vector<1x128xf32> to vector<8x128xf32>
    %153 = arith.addf %151, %152 : vector<8x128xf32>
    %154 = vector.extract_strided_slice %153 {offsets = [0, 0], sizes = [8, 32], strides = [1, 1]} : vector<8x128xf32> to vector<8x32xf32>
    %155 = vector.extract_strided_slice %153 {offsets = [0, 32], sizes = [8, 32], strides = [1, 1]} : vector<8x128xf32> to vector<8x32xf32>
    %156 = vector.extract_strided_slice %153 {offsets = [0, 64], sizes = [8, 32], strides = [1, 1]} : vector<8x128xf32> to vector<8x32xf32>
    %157 = vector.extract_strided_slice %153 {offsets = [0, 96], sizes = [8, 32], strides = [1, 1]} : vector<8x128xf32> to vector<8x32xf32>
    %158 = arith.mulf %155, %124 : vector<8x32xf32>
    %159 = arith.mulf %154, %156 : vector<8x32xf32>
    %160 = arith.addf %158, %159 : vector<8x32xf32>
    %161 = math.tanh %160 : vector<8x32xf32>
    %162 = arith.mulf %157, %161 : vector<8x32xf32>
    %163 = vector.extract_strided_slice %17 {offsets = [32, 0], sizes = [8, 128], strides = [1, 1]} : vector<64x128xf32> to vector<8x128xf32>
    %164 = vector.extract_strided_slice %145 {offsets = [0, 0], sizes = [8, 128], strides = [1, 1]} : vector<8x256xf32> to vector<8x128xf32>
    %165 = arith.addf %163, %164 : vector<8x128xf32>
    %166 = math.tanh %165 : vector<8x128xf32>
    %167 = vector.broadcast %8 : vector<1x128xf32> to vector<8x128xf32>
    %168 = arith.mulf %166, %167 : vector<8x128xf32>
    %169 = vector.broadcast %11 : vector<1x128xf32> to vector<8x128xf32>
    %170 = arith.addf %168, %169 : vector<8x128xf32>
    %171 = vector.extract_strided_slice %170 {offsets = [0, 0], sizes = [8, 32], strides = [1, 1]} : vector<8x128xf32> to vector<8x32xf32>
    %172 = vector.extract_strided_slice %170 {offsets = [0, 32], sizes = [8, 32], strides = [1, 1]} : vector<8x128xf32> to vector<8x32xf32>
    %173 = vector.extract_strided_slice %170 {offsets = [0, 64], sizes = [8, 32], strides = [1, 1]} : vector<8x128xf32> to vector<8x32xf32>
    %174 = vector.extract_strided_slice %170 {offsets = [0, 96], sizes = [8, 32], strides = [1, 1]} : vector<8x128xf32> to vector<8x32xf32>
    %175 = arith.mulf %172, %141 : vector<8x32xf32>
    %176 = arith.mulf %171, %173 : vector<8x32xf32>
    %177 = arith.addf %175, %176 : vector<8x32xf32>
    %178 = math.tanh %177 : vector<8x32xf32>
    %179 = arith.mulf %174, %178 : vector<8x32xf32>
    %180 = tpu.concatenate %179, %162 in 1 : vector<8x32xf32>, vector<8x32xf32> -> vector<8x64xf32>
    %cst_18 = arith.constant dense<0.000000e+00> : vector<8x256xf32>
    %181 = tpu.matmul %180, %18, %cst_18 {dimension_numbers = #tpu.dot_dimension_numbers<[1], [0], [0], [1], [0, 0, 1, 1], [], []>} : vector<8x64xf32>, vector<64x256xf32>, vector<8x256xf32> -> vector<8x256xf32>
    %182 = vector.extract_strided_slice %181 {offsets = [0, 128], sizes = [8, 128], strides = [1, 1]} : vector<8x256xf32> to vector<8x128xf32>
    %183 = vector.broadcast %19 : vector<1x128xf32> to vector<8x128xf32>
    %184 = arith.addf %182, %183 : vector<8x128xf32>
    %185 = math.tanh %184 : vector<8x128xf32>
    %186 = vector.broadcast %8 : vector<1x128xf32> to vector<8x128xf32>
    %187 = arith.mulf %185, %186 : vector<8x128xf32>
    %188 = vector.broadcast %11 : vector<1x128xf32> to vector<8x128xf32>
    %189 = arith.addf %187, %188 : vector<8x128xf32>
    %190 = vector.extract_strided_slice %189 {offsets = [0, 0], sizes = [8, 32], strides = [1, 1]} : vector<8x128xf32> to vector<8x32xf32>
    %191 = vector.extract_strided_slice %189 {offsets = [0, 32], sizes = [8, 32], strides = [1, 1]} : vector<8x128xf32> to vector<8x32xf32>
    %192 = vector.extract_strided_slice %189 {offsets = [0, 64], sizes = [8, 32], strides = [1, 1]} : vector<8x128xf32> to vector<8x32xf32>
    %193 = vector.extract_strided_slice %189 {offsets = [0, 96], sizes = [8, 32], strides = [1, 1]} : vector<8x128xf32> to vector<8x32xf32>
    %194 = arith.mulf %191, %160 : vector<8x32xf32>
    %195 = arith.mulf %190, %192 : vector<8x32xf32>
    %196 = arith.addf %194, %195 : vector<8x32xf32>
    %197 = math.tanh %196 : vector<8x32xf32>
    %198 = arith.mulf %193, %197 : vector<8x32xf32>
    %199 = vector.extract_strided_slice %17 {offsets = [40, 0], sizes = [8, 128], strides = [1, 1]} : vector<64x128xf32> to vector<8x128xf32>
    %200 = vector.extract_strided_slice %181 {offsets = [0, 0], sizes = [8, 128], strides = [1, 1]} : vector<8x256xf32> to vector<8x128xf32>
    %201 = arith.addf %199, %200 : vector<8x128xf32>
    %202 = math.tanh %201 : vector<8x128xf32>
    %203 = vector.broadcast %8 : vector<1x128xf32> to vector<8x128xf32>
    %204 = arith.mulf %202, %203 : vector<8x128xf32>
    %205 = vector.broadcast %11 : vector<1x128xf32> to vector<8x128xf32>
    %206 = arith.addf %204, %205 : vector<8x128xf32>
    %207 = vector.extract_strided_slice %206 {offsets = [0, 0], sizes = [8, 32], strides = [1, 1]} : vector<8x128xf32> to vector<8x32xf32>
    %208 = vector.extract_strided_slice %206 {offsets = [0, 32], sizes = [8, 32], strides = [1, 1]} : vector<8x128xf32> to vector<8x32xf32>
    %209 = vector.extract_strided_slice %206 {offsets = [0, 64], sizes = [8, 32], strides = [1, 1]} : vector<8x128xf32> to vector<8x32xf32>
    %210 = vector.extract_strided_slice %206 {offsets = [0, 96], sizes = [8, 32], strides = [1, 1]} : vector<8x128xf32> to vector<8x32xf32>
    %211 = arith.mulf %208, %177 : vector<8x32xf32>
    %212 = arith.mulf %207, %209 : vector<8x32xf32>
    %213 = arith.addf %211, %212 : vector<8x32xf32>
    %214 = math.tanh %213 : vector<8x32xf32>
    %215 = arith.mulf %210, %214 : vector<8x32xf32>
    %216 = tpu.concatenate %215, %198 in 1 : vector<8x32xf32>, vector<8x32xf32> -> vector<8x64xf32>
    %cst_19 = arith.constant dense<0.000000e+00> : vector<8x256xf32>
    %217 = tpu.matmul %216, %18, %cst_19 {dimension_numbers = #tpu.dot_dimension_numbers<[1], [0], [0], [1], [0, 0, 1, 1], [], []>} : vector<8x64xf32>, vector<64x256xf32>, vector<8x256xf32> -> vector<8x256xf32>
    %218 = vector.extract_strided_slice %217 {offsets = [0, 128], sizes = [8, 128], strides = [1, 1]} : vector<8x256xf32> to vector<8x128xf32>
    %219 = vector.broadcast %19 : vector<1x128xf32> to vector<8x128xf32>
    %220 = arith.addf %218, %219 : vector<8x128xf32>
    %221 = math.tanh %220 : vector<8x128xf32>
    %222 = vector.broadcast %8 : vector<1x128xf32> to vector<8x128xf32>
    %223 = arith.mulf %221, %222 : vector<8x128xf32>
    %224 = vector.broadcast %11 : vector<1x128xf32> to vector<8x128xf32>
    %225 = arith.addf %223, %224 : vector<8x128xf32>
    %226 = vector.extract_strided_slice %225 {offsets = [0, 0], sizes = [8, 32], strides = [1, 1]} : vector<8x128xf32> to vector<8x32xf32>
    %227 = vector.extract_strided_slice %225 {offsets = [0, 32], sizes = [8, 32], strides = [1, 1]} : vector<8x128xf32> to vector<8x32xf32>
    %228 = vector.extract_strided_slice %225 {offsets = [0, 64], sizes = [8, 32], strides = [1, 1]} : vector<8x128xf32> to vector<8x32xf32>
    %229 = vector.extract_strided_slice %225 {offsets = [0, 96], sizes = [8, 32], strides = [1, 1]} : vector<8x128xf32> to vector<8x32xf32>
    %230 = arith.mulf %227, %196 : vector<8x32xf32>
    %231 = arith.mulf %226, %228 : vector<8x32xf32>
    %232 = arith.addf %230, %231 : vector<8x32xf32>
    %233 = math.tanh %232 : vector<8x32xf32>
    %234 = arith.mulf %229, %233 : vector<8x32xf32>
    %235 = vector.extract_strided_slice %17 {offsets = [48, 0], sizes = [8, 128], strides = [1, 1]} : vector<64x128xf32> to vector<8x128xf32>
    %236 = vector.extract_strided_slice %217 {offsets = [0, 0], sizes = [8, 128], strides = [1, 1]} : vector<8x256xf32> to vector<8x128xf32>
    %237 = arith.addf %235, %236 : vector<8x128xf32>
    %238 = math.tanh %237 : vector<8x128xf32>
    %239 = vector.broadcast %8 : vector<1x128xf32> to vector<8x128xf32>
    %240 = arith.mulf %238, %239 : vector<8x128xf32>
    %241 = vector.broadcast %11 : vector<1x128xf32> to vector<8x128xf32>
    %242 = arith.addf %240, %241 : vector<8x128xf32>
    %243 = vector.extract_strided_slice %242 {offsets = [0, 0], sizes = [8, 32], strides = [1, 1]} : vector<8x128xf32> to vector<8x32xf32>
    %244 = vector.extract_strided_slice %242 {offsets = [0, 32], sizes = [8, 32], strides = [1, 1]} : vector<8x128xf32> to vector<8x32xf32>
    %245 = vector.extract_strided_slice %242 {offsets = [0, 64], sizes = [8, 32], strides = [1, 1]} : vector<8x128xf32> to vector<8x32xf32>
    %246 = vector.extract_strided_slice %242 {offsets = [0, 96], sizes = [8, 32], strides = [1, 1]} : vector<8x128xf32> to vector<8x32xf32>
    %247 = arith.mulf %244, %213 : vector<8x32xf32>
    %248 = arith.mulf %243, %245 : vector<8x32xf32>
    %249 = arith.addf %247, %248 : vector<8x32xf32>
    %250 = math.tanh %249 : vector<8x32xf32>
    %251 = arith.mulf %246, %250 : vector<8x32xf32>
    %252 = tpu.concatenate %251, %234 in 1 : vector<8x32xf32>, vector<8x32xf32> -> vector<8x64xf32>
    %cst_20 = arith.constant dense<0.000000e+00> : vector<8x256xf32>
    %253 = tpu.matmul %252, %18, %cst_20 {dimension_numbers = #tpu.dot_dimension_numbers<[1], [0], [0], [1], [0, 0, 1, 1], [], []>} : vector<8x64xf32>, vector<64x256xf32>, vector<8x256xf32> -> vector<8x256xf32>
    %254 = vector.extract_strided_slice %253 {offsets = [0, 128], sizes = [8, 128], strides = [1, 1]} : vector<8x256xf32> to vector<8x128xf32>
    %255 = vector.broadcast %19 : vector<1x128xf32> to vector<8x128xf32>
    %256 = arith.addf %254, %255 : vector<8x128xf32>
    %257 = math.tanh %256 : vector<8x128xf32>
    %258 = vector.broadcast %8 : vector<1x128xf32> to vector<8x128xf32>
    %259 = arith.mulf %257, %258 : vector<8x128xf32>
    %260 = vector.broadcast %11 : vector<1x128xf32> to vector<8x128xf32>
    %261 = arith.addf %259, %260 : vector<8x128xf32>
    %262 = vector.extract_strided_slice %261 {offsets = [0, 0], sizes = [8, 32], strides = [1, 1]} : vector<8x128xf32> to vector<8x32xf32>
    %263 = vector.extract_strided_slice %261 {offsets = [0, 32], sizes = [8, 32], strides = [1, 1]} : vector<8x128xf32> to vector<8x32xf32>
    %264 = vector.extract_strided_slice %261 {offsets = [0, 64], sizes = [8, 32], strides = [1, 1]} : vector<8x128xf32> to vector<8x32xf32>
    %265 = vector.extract_strided_slice %261 {offsets = [0, 96], sizes = [8, 32], strides = [1, 1]} : vector<8x128xf32> to vector<8x32xf32>
    %266 = arith.mulf %263, %232 : vector<8x32xf32>
    %267 = arith.mulf %262, %264 : vector<8x32xf32>
    %268 = arith.addf %266, %267 : vector<8x32xf32>
    %269 = math.tanh %268 : vector<8x32xf32>
    %270 = arith.mulf %265, %269 : vector<8x32xf32>
    %271 = vector.extract_strided_slice %17 {offsets = [56, 0], sizes = [8, 128], strides = [1, 1]} : vector<64x128xf32> to vector<8x128xf32>
    %272 = vector.extract_strided_slice %253 {offsets = [0, 0], sizes = [8, 128], strides = [1, 1]} : vector<8x256xf32> to vector<8x128xf32>
    %273 = arith.addf %271, %272 : vector<8x128xf32>
    %274 = math.tanh %273 : vector<8x128xf32>
    %275 = vector.broadcast %8 : vector<1x128xf32> to vector<8x128xf32>
    %276 = arith.mulf %274, %275 : vector<8x128xf32>
    %277 = vector.broadcast %11 : vector<1x128xf32> to vector<8x128xf32>
    %278 = arith.addf %276, %277 : vector<8x128xf32>
    %279 = vector.extract_strided_slice %278 {offsets = [0, 0], sizes = [8, 32], strides = [1, 1]} : vector<8x128xf32> to vector<8x32xf32>
    %280 = vector.extract_strided_slice %278 {offsets = [0, 32], sizes = [8, 32], strides = [1, 1]} : vector<8x128xf32> to vector<8x32xf32>
    %281 = vector.extract_strided_slice %278 {offsets = [0, 64], sizes = [8, 32], strides = [1, 1]} : vector<8x128xf32> to vector<8x32xf32>
    %282 = vector.extract_strided_slice %278 {offsets = [0, 96], sizes = [8, 32], strides = [1, 1]} : vector<8x128xf32> to vector<8x32xf32>
    %283 = arith.mulf %280, %249 : vector<8x32xf32>
    %284 = arith.mulf %279, %281 : vector<8x32xf32>
    %285 = arith.addf %283, %284 : vector<8x32xf32>
    %286 = math.tanh %285 : vector<8x32xf32>
    %287 = arith.mulf %282, %286 : vector<8x32xf32>
    %288 = tpu.concatenate %287, %270 in 1 : vector<8x32xf32>, vector<8x32xf32> -> vector<8x64xf32>
    %cst_21 = arith.constant dense<0.000000e+00> : vector<8x256xf32>
    %289 = tpu.matmul %288, %18, %cst_21 {dimension_numbers = #tpu.dot_dimension_numbers<[1], [0], [0], [1], [0, 0, 1, 1], [], []>} : vector<8x64xf32>, vector<64x256xf32>, vector<8x256xf32> -> vector<8x256xf32>
    %290 = vector.extract_strided_slice %289 {offsets = [0, 128], sizes = [8, 128], strides = [1, 1]} : vector<8x256xf32> to vector<8x128xf32>
    %291 = vector.broadcast %19 : vector<1x128xf32> to vector<8x128xf32>
    %292 = arith.addf %290, %291 : vector<8x128xf32>
    %293 = math.tanh %292 : vector<8x128xf32>
    %294 = vector.broadcast %8 : vector<1x128xf32> to vector<8x128xf32>
    %295 = arith.mulf %293, %294 : vector<8x128xf32>
    %296 = vector.broadcast %11 : vector<1x128xf32> to vector<8x128xf32>
    %297 = arith.addf %295, %296 : vector<8x128xf32>
    %298 = vector.extract_strided_slice %297 {offsets = [0, 0], sizes = [8, 32], strides = [1, 1]} : vector<8x128xf32> to vector<8x32xf32>
    %299 = vector.extract_strided_slice %297 {offsets = [0, 32], sizes = [8, 32], strides = [1, 1]} : vector<8x128xf32> to vector<8x32xf32>
    %300 = vector.extract_strided_slice %297 {offsets = [0, 64], sizes = [8, 32], strides = [1, 1]} : vector<8x128xf32> to vector<8x32xf32>
    %301 = vector.extract_strided_slice %297 {offsets = [0, 96], sizes = [8, 32], strides = [1, 1]} : vector<8x128xf32> to vector<8x32xf32>
    %302 = arith.mulf %299, %268 : vector<8x32xf32>
    %303 = arith.mulf %298, %300 : vector<8x32xf32>
    %304 = arith.addf %302, %303 : vector<8x32xf32>
    %305 = math.tanh %304 : vector<8x32xf32>
    %306 = arith.mulf %301, %305 : vector<8x32xf32>
    %307 = tpu.concatenate %54, %90, %126, %162, %198, %234, %270, %306 in 1 : vector<8x32xf32>, vector<8x32xf32>, vector<8x32xf32>, vector<8x32xf32>, vector<8x32xf32>, vector<8x32xf32>, vector<8x32xf32>, vector<8x32xf32> -> vector<8x256xf32>
    %c0_22 = arith.constant 0 : index
    %c0_23 = arith.constant 0 : index
    %308 = vector.load %arg6[%c0_22, %c0_23] : memref<8x256xf32, #tpu.memory_space<vmem>>, vector<8x256xf32>
    tpu.vector_store %arg6[%c0_22, %c0_23], %307 {strides = array<i32>} : memref<8x256xf32, #tpu.memory_space<vmem>>, vector<8x256xf32>,
    %309 = tpu.concatenate %287, %285, %306, %304 in 1 : vector<8x32xf32>, vector<8x32xf32>, vector<8x32xf32>, vector<8x32xf32> -> vector<8x128xf32>
    %c0_24 = arith.constant 0 : index
    %c0_25 = arith.constant 0 : index
    %310 = vector.load %arg7[%c0_24, %c0_25] : memref<8x128xf32, #tpu.memory_space<vmem>>, vector<8x128xf32>
    tpu.vector_store %arg7[%c0_24, %c0_25], %309 {strides = array<i32>} : memref<8x128xf32, #tpu.memory_space<vmem>>, vector<8x128xf32>,
    return
  }
  func.func @transform_0(%arg0: i32) -> (i32, i32) {
    %c0_i32 = arith.constant 0 : i32
    %c0_i32_0 = arith.constant 0 : i32
    %c0_i32_1 = arith.constant 0 : i32
    return %c0_i32, %c0_i32_0 : i32, i32
  }
  func.func @transform_1(%arg0: i32) -> (i32, i32) {
    %c0_i32 = arith.constant 0 : i32
    %c0_i32_0 = arith.constant 0 : i32
    %c0_i32_1 = arith.constant 0 : i32
    return %c0_i32, %c0_i32_0 : i32, i32
  }
  func.func @transform_2(%arg0: i32) -> (i32, i32) {
    %c0_i32 = arith.constant 0 : i32
    %c0_i32_0 = arith.constant 0 : i32
    %c0_i32_1 = arith.constant 0 : i32
    return %c0_i32, %c0_i32_0 : i32, i32
  }
  func.func @transform_3(%arg0: i32) -> (i32, i32) {
    %c0_i32 = arith.constant 0 : i32
    %c0_i32_0 = arith.constant 0 : i32
    %c0_i32_1 = arith.constant 0 : i32
    return %c0_i32, %c0_i32_0 : i32, i32
  }
  func.func @transform_4(%arg0: i32) -> (i32, i32) {
    %c0_i32 = arith.constant 0 : i32
    %c0_i32_0 = arith.constant 0 : i32
    %c0_i32_1 = arith.constant 0 : i32
    return %c0_i32, %c0_i32_0 : i32, i32
  }
  func.func @transform_5(%arg0: i32) -> (i32, i32) {
    %c0_i32 = arith.constant 0 : i32
    %c0_i32_0 = arith.constant 0 : i32
    %c0_i32_1 = arith.constant 0 : i32
    return %c0_i32, %c0_i32_0 : i32, i32
  }
  func.func @transform_6(%arg0: i32) -> (i32, i32) {
    %c0_i32 = arith.constant 0 : i32
    %c0_i32_0 = arith.constant 0 : i32
    %c0_i32_1 = arith.constant 0 : i32
    return %c0_i32, %c0_i32_0 : i32, i32
  }
}

</mosaic_0001>

<bundles_post_ra>
// kernel: tpu_custom_call.1
= control target key start
LH: loop header
LB: loop body
LE: loop exit
PB: predicated region body
PF: predicated region fallthrough
CT: control target
= control target key end

     0   :  { %12 = vsyncpa [#allocation3], 0  ;;  %s2013_s0 = inlined_call_operand.vmem [shape: f32[64,16], index: 0, kind: input, shape index: {}]   ;;  %s2014_s1 = inlined_call_operand.vmem [shape: f32[16,128], index: 1, kind: input, shape index: {}]   ;;  %s2015_s2 = inlined_call_operand.vmem [shape: f32[1,128], index: 2, kind: input, shape index: {}]   ;;  %s2016_s3 = inlined_call_operand.hbm [shape: f32[64,256], index: 3, kind: input, shape index: {}]   ;;  %s2017_s4 = inlined_call_operand.vmem [shape: f32[1,128], index: 4, kind: input, shape index: {}]   ;;  %s2018_s5 = inlined_call_operand.hbm [shape: f32[8,256], index: 5, kind: output, shape index: {0}]   ;;  %s2019_s6 = inlined_call_operand.hbm [shape: f32[8,128], index: 6, kind: output, shape index: {1}]  }
   0x1   :  { %13 = vsyncpa [#allocation4], 0 }
   0x2   :  { %14 = vsyncpa [#allocation7], 0  ;;  %s1595_s21 = smov [#allocation2]   ;;  %s1523_s25 = scalar_lea.hbm %s2016_s3, 2048 }
   0x3   :  { %s26_s22 = sshll.u32 %s1595_s21, 4  ;;  %p1524_p0 = scmp.ne.s32.totalorder %s2016_s3, %s1523_s25  ;;  %s27_s22 = int_to_ptr.vmem [resolvable:$true] %s26_s22 }
   0x4   :  { %p1527_p1 = scmp.lt.u32.totalorder %s1523_s25, %s2016_s3 }
   0x6   :  { %p1529_p2 = pnand %p1527_p1, %p1524_p0 }
   0x8   :  { %1532 = shalt.err (!%p1529_p2)
}
   0x9   :  { %s1533_s30 = scalar_lea.vmem %s27_s22, 2048  ;;  %p1538_p4 = scmp.lt.s32.totalorder %s27_s22, %s27_s22 }
   0xa   :  { %p1534_p3 = scmp.ne.s32.totalorder %s27_s22, %s1533_s30  ;;  %p1539_p5 = scmp.lt.s32.totalorder %s1533_s30, %s1533_s30 }
   0xc   :  { %p1540_p6 = por %p1539_p5, %p1538_p4 }
   0xe   :  { %p1541_p7 = pnand %p1540_p6, %p1534_p3 }
  0x10   :  { %1544 = shalt.err (!%p1541_p7)
}
  0x11   :  { %s1596_s7 = smov 256   ;;  %s1597_s8 = smov 16  }
  0x12   :  { %32 = dma.hbm_to_vmem [thread:$0]  %s2016_s3, 2048, %s27_s22, [#allocation3], %s1596_s7, %s1596_s7, %s1597_s8  }
  0x13   :  { %1589 = dma.done.wait [#allocation3], 2048  }
  0x14   :  { %1590 = vsyncadd [#allocation3], 4294965248  ;;  %vm62_vm0 = vcmask 130048   ;;  %v53_v0 = vld [vmem:[%s2014_s1] sm:$0xff]  ;;  %v54_v1 = vld [vmem:[%s2014_s1 + $0x8] sm:$0xff]  ;;  %v38_v5 = vlaneseq  ;;  %v1598_v11 = vmov 0.5  }
  0x15   :  { %v45_v2 = vld [vmem:[%s2013_s0] sm:$0xff]  ;;  %v1317_v3 = vpack.c.bf16 %v54_v1, %v53_v0  ;;  %v46_v4 = vld [vmem:[%s2013_s0 + $0x8] sm:$0xff]  ;;  %s1599_s1 = smov 64   ;;  %v195_v23 = vld [vmem:[#allocation2 + $0x18] sm:$0xff]  ;;  %v1601_v47 = vmov 0.0   ;;  %vm233_vm4 = vcmask 261120  }
  0x16   :  { %1305 = vmatprep.mubr.msk.f32.mxu0 %vm62_vm0, %v45_v2  ;;  %v1669_v6 = vld [vmem:[%s2015_s2] ss:$0 sm:$0xff]  ;;  %v39_v10 = vand.u32 127, %v38_v5  ;;  %s1600_s2 = smov 32   ;;  %v193_v22 = vld [vmem:[#allocation2 + $0x8] sm:$0xff]  ;;  %v194_v26 = vld [vmem:[#allocation2 + $0x10] sm:$0xff]  ;;  %303 = vmatprep.mubr.f32.mxu1 %v1601_v47 }
  0x17   :  { %1318 = vmatprep.subr.bf16.mxu0 %v1317_v3  ;;  %v192_v24 = vld [vmem:[#allocation2] sm:$0xff]  ;;  %v1685_v25 = vpack.c.bf16 %v195_v23, %v193_v22  ;;  %v197_v27 = vld [vmem:[#allocation2 + $0x28] sm:$0xff]  ;;  %v199_v28 = vld [vmem:[#allocation2 + $0x38] sm:$0xff]  ;;  %vm235_vm5 = vcmask 523264   ;;  %vm1225_vm6 = vcmask 785408   ;;  %s1603_s9 = smov [#allocation5]  }
  0x18   :  { %1320 = vmatpush3.bf16.msra.mxu0 %v1317_v3  ;;  %vm40_vm1 = vcmp.ge.s32.totalorder %v39_v10, 64  ;;  %vm41_vm2 = vcmp.lt.s32.totalorder %v39_v10, 96  ;;  %v1687_v29 = vpack.c.bf16 %v194_v26, %v192_v24  ;;  %v1689_v30 = vpack.c.bf16 %v199_v28, %v197_v27  ;;  %v196_v31 = vld [vmem:[#allocation2 + $0x20] sm:$0xff]  ;;  %v198_v32 = vld [vmem:[#allocation2 + $0x30] sm:$0xff]  ;;  %v201_v33 = vld [vmem:[#allocation2 + $0x48] sm:$0xff]  ;;  %s1250_s10 = sshll.u32 %s1603_s9, 4  ;;  %s1251_s10 = int_to_ptr.vmem [resolvable:$true] %s1250_s10 }
  0x19   :  { %vm42_vm3 = vmand %vm40_vm1, %vm41_vm2  ;;  %1322 = vmatprep.subr.bf16.mxu1 %v1685_v25  ;;  %v203_v34 = vld [vmem:[#allocation2 + $0x58] sm:$0xff]  ;;  %1338 = vmatprep.subr.bf16.mxu0 %v1685_v25  ;;  %v1694_v35 = vpack.c.bf16 %v198_v32, %v196_v31  ;;  %v200_v37 = vld [vmem:[#allocation2 + $0x40] sm:$0xff]  ;;  %s1545_s11 = scalar_lea.vmem %s1251_s10, 256  ;;  %p1550_p9 = scmp.lt.s32.totalorder %s1251_s10, %s1251_s10 }
  0x1a   :  { %v1674_v12 = vsel %vm42_vm3, 1.0, %v1598_v11  ;;  %v1676_v14 = vsel %vm42_vm3, 0.0, %v1598_v11  ;;  %1324 = vmatpush1.bf16.msra.mxu1 %v1687_v29  ;;  %v1698_v36 = vpack.c.bf16 %v203_v34, %v201_v33  ;;  %v202_v38 = vld [vmem:[#allocation2 + $0x50] sm:$0xff]  ;;  %v205_v39 = vld [vmem:[#allocation2 + $0x68] sm:$0xff]  ;;  %v207_v40 = vld [vmem:[#allocation2 + $0x78] sm:$0xff]  ;;  %p1546_p8 = scmp.ne.s32.totalorder %s1251_s10, %s1545_s11  ;;  %p1551_p10 = scmp.lt.s32.totalorder %s1545_s11, %s1545_s11 }
  0x1b   :  { %1306 = vmatmul.mubr.msk.f32.vlgmr.msra.gmra.mrb[0].mxu0 %vm62_vm0, %v46_v4  ;;  %1326 = vmatprep.subr.bf16.mxu1 %v1689_v30  ;;  %v1702_v41 = vpack.c.bf16 %v202_v38, %v200_v37  ;;  %v1706_v42 = vpack.c.bf16 %v207_v40, %v205_v39  ;;  %v204_v43 = vld [vmem:[#allocation2 + $0x60] sm:$0xff]  ;;  %v206_v44 = vld [vmem:[#allocation2 + $0x70] sm:$0xff] }
  0x1c   :  { %1340 = vmatpush1.bf16.msra.mxu0 %v1687_v29  ;;  %v1711_v46 = vpack.c.bf16 %v206_v44, %v204_v43  ;;  %v1738_v53 = vld [vmem:[%s2017_s4] ss:$0 sm:$0xff]  ;;  %v47_v11 = vld [vmem:[%s2013_s0 + $0x10] sm:$0xff]  ;;  %p1552_p11 = por %p1551_p10, %p1550_p9 }
  0x1d   :  { %1342 = vmatprep.subr.bf16.mxu0 %v1689_v30  ;;  %1308 = vmatprep.mubr.msk.f32.mxu0 %vm62_vm0, %v47_v11 }
  0x1e   :  { %1328 = vmatpush1.bf16.msra.mxu1 %v1694_v35  ;;  %p1553_p12 = pnand %p1552_p11, %p1546_p8 }
  0x1f   :  { %1330 = vmatprep.subr.bf16.mxu1 %v1698_v36 }
  0x20   :  { %1344 = vmatpush1.bf16.msra.mxu0 %v1694_v35 }
  0x21   :  { %1346 = vmatprep.subr.bf16.mxu0 %v1698_v36 }
  0x22   :  { %1332 = vmatpush1.bf16.msra.mxu1 %v1702_v41 }
  0x23   :  { %1334 = vmatprep.subr.bf16.mxu1 %v1706_v42 }
  0x24   :  { %1348 = vmatpush1.bf16.msra.mxu0 %v1702_v41 }
  0x25   :  { %1350 = vmatprep.subr.bf16.mxu0 %v1706_v42 }
  0x26   :  { %1336 = vmatpush1.bf16.msra.mxu1 %v1711_v46 }
  0x27   :  { %1354 = vmatprep.subr.bf16.mxu1 %v1685_v25 }
  0x28   :  { %1352 = vmatpush1.bf16.msra.mxu0 %v1711_v46 }
  0x29   :  { %1370 = vmatprep.subr.bf16.mxu0 %v1685_v25 }
  0xee   :  { %v1671_v7 = vpop.f32.mrb[0].mxu0 }
  0xef   :  { %v153_v8 = vpop.f32.mrb[1].mxu0  ;;  %v159_v52 = vadd.f32 %v1671_v7, %v1669_v6 }
  0xf0   :  { %v154_v9 = vadd.f32 %v1669_v6, %v153_v8 }
  0xf2   :  { %1459 = vtanh.f32 %v154_v9 }
  0xfc   :  { %v1460_v13 = vpop.eup %1459 }
  0xfd   :  { %v210_v15 = vmul.f32 %v1460_v13, %v1674_v12  ;;  %v48_v13 = vld [vmem:[%s2013_s0 + $0x18] sm:$0xff] }
  0xfe   :  { %1309 = vmatmul.mubr.msk.f32.gmra.mrb[2].mxu0 %vm62_vm0, %v48_v13 }
  0xff   :  { %v211_v16 = vadd.f32 %v210_v15, %v1676_v14  ;;  %v49_v15 = vld [vmem:[%s2013_s0 + $0x20] sm:$0xff] }
 0x100   :  { %1311 = vmatprep.mubr.msk.f32.mxu0 %vm62_vm0, %v49_v15 }
 0x101   :  { %214 = vrot.lane.b32.xlu0 %v211_v16, %s1599_s1  ;;  %v212_v19 = vmul.f32 0.0, %v211_v16 }
 0x173   :  { %v215_v17 = vpop.permute.xlu0 %214 }
 0x174   :  { %v217_v18 = vmul.f32 %v215_v17, %v211_v16  ;;  %v51_v17 = vld [vmem:[%s2013_s0 + $0x30] sm:$0xff] }
 0x176   :  { %219 = vrot.lane.b32.xlu0 %v217_v18, %s1600_s2  ;;  %v52_v18 = vld [vmem:[%s2013_s0 + $0x38] sm:$0xff] }
 0x1d1   :  { %v1788_v26 = vpop.f32.mrb[2].mxu0 }
 0x1d2   :  { %v163_v27 = vpop.f32.mrb[3].mxu0  ;;  %v169_v11 = vadd.f32 %v1788_v26, %v1669_v6 }
 0x1d3   :  { %v164_v39 = vadd.f32 %v1669_v6, %v163_v27 }
 0x1e8   :  { %v220_v20 = vpop.permute.xlu0 %219 }
 0x1e9   :  { %v1682_v21 = vadd.f32 %v220_v20, %v212_v19 }
 0x1eb   :  { %1461 = vtanh.f32 %v1682_v21 }
 0x1f5   :  { %v1462_v45 = vpop.eup %1461 }
 0x1f6   :  { %225 = vrot.lane.b32.xlu1 %v1462_v45, %s1599_s1 }
 0x268   :  { %v226_v48 = vpop.permute.xlu1 %225 }
 0x269   :  { %v228_v49 = vmul.f32 %v226_v48, %v211_v16  ;;  %v50_v16 = vld [vmem:[%s2013_s0 + $0x28] sm:$0xff]  ;;  %s1602_s0 = smov 96  }
 0x26a   :  { %1312 = vmatmul.mubr.msk.f32.gmra.mrb[4].mxu0 %vm62_vm0, %v50_v16 }
 0x26b   :  { %230 = vrot.lane.b32.xlu1 %v228_v49, %s1600_s2  ;;  %1314 = vmatprep.mubr.msk.f32.mxu0 %vm62_vm0, %v51_v17 }
 0x26e   :  { %1315 = vmatmul.mubr.msk.f32.gmra.mrb[6].mxu0 %vm62_vm0, %v52_v18 }
 0x26f   :  { %434 = vmatprep.mubr.f32.mxu0 %v1601_v47 }
 0x2dd   :  { %v231_v50 = vpop.permute.xlu1 %230 }
 0x2de   :  { %v234_v51 = vsel %vm233_vm4, %v231_v50, 0.0 }
 0x2df   :  { %1282 = vmatmul.mubr.msk.f32.vlgmr.msra.gmra.mrb[0].mxu1 %vm235_vm5, %v234_v51 }
 0x2e0   :  { %1356 = vmatpush1.bf16.msra.mxu1 %v1687_v29  ;;  %559 = vmatprep.mubr.f32.mxu1 %v1601_v47 }
 0x2e1   :  { %1358 = vmatprep.subr.bf16.mxu1 %v1689_v30 }
 0x2e4   :  { %1360 = vmatpush1.bf16.msra.mxu1 %v1694_v35 }
 0x2e5   :  { %1362 = vmatprep.subr.bf16.mxu1 %v1698_v36 }
 0x2e8   :  { %1364 = vmatpush1.bf16.msra.mxu1 %v1702_v41 }
 0x2e9   :  { %1366 = vmatprep.subr.bf16.mxu1 %v1706_v42 }
 0x2ec   :  { %1368 = vmatpush1.bf16.msra.mxu1 %v1711_v46 }
 0x2ed   :  { %1386 = vmatprep.subr.bf16.mxu1 %v1685_v25 }
 0x33d   :  { %v1790_v28 = vpop.f32.mrb[4].mxu0 }
 0x33e   :  { %v1792_v31 = vpop.f32.mrb[5].mxu0 }
 0x341   :  { %v1794_v32 = vpop.f32.mrb[6].mxu0 }
 0x342   :  { %v1796_v33 = vpop.f32.mrb[7].mxu0 }
 0x3b2   :  { %v305_v54 = vpop.f32.mrb[0].mxu1 }
 0x3b3   :  { %v337_v55 = vadd.f32 %v305_v54, %v159_v52  ;;  %v307_v56 = vpop.f32.mrb[1].mxu1 }
 0x3b4   :  { %v316_v57 = vadd.f32 %v1738_v53, %v307_v56 }
 0x3b5   :  { %1463 = vtanh.f32 %v337_v55 }
 0x3b6   :  { %1465 = vtanh.f32 %v316_v57 }
 0x3bf   :  { %v1464_v58 = vpop.eup %1463 }
 0x3c0   :  { %v1466_v59 = vpop.eup %1465  ;;  %v339_v60 = vmul.f32 %v1464_v58, %v1674_v12 }
 0x3c1   :  { %v318_v61 = vmul.f32 %v1466_v59, %v1674_v12 }
 0x3c2   :  { %v340_v62 = vadd.f32 %v339_v60, %v1676_v14 }
 0x3c3   :  { %v319_v63 = vadd.f32 %v318_v61, %v1676_v14 }
 0x3c4   :  { %343 = vrot.lane.b32.xlu1 %v340_v62, %s1599_s1  ;;  %v341_v4 = vmul.f32 %v340_v62, %v1682_v21 }
 0x3c5   :  { %322 = vrot.lane.b32.xlu0 %v319_v63, %s1599_s1  ;;  %v320_v7 = vmul.f32 0.0, %v319_v63 }
 0x436   :  { %v344_v0 = vpop.permute.xlu1 %343 }
 0x437   :  { %v346_v1 = vmul.f32 %v344_v0, %v340_v62  ;;  %v323_v2 = vpop.permute.xlu0 %322 }
 0x438   :  { %v325_v3 = vmul.f32 %v323_v2, %v319_v63 }
 0x439   :  { %348 = vrot.lane.b32.xlu1 %v346_v1, %s1600_s2 }
 0x43a   :  { %327 = vrot.lane.b32.xlu0 %v325_v3, %s1600_s2 }
 0x4ab   :  { %v349_v5 = vpop.permute.xlu1 %348 }
 0x4ac   :  { %v1750_v8 = vadd.f32 %v349_v5, %v341_v4  ;;  %v328_v9 = vpop.permute.xlu0 %327 }
 0x4ad   :  { %v1752_v10 = vadd.f32 %v328_v9, %v320_v7 }
 0x4ae   :  { %1467 = vtanh.f32 %v1750_v8 }
 0x4af   :  { %1469 = vtanh.f32 %v1752_v10 }
 0x4b8   :  { %v1468_v19 = vpop.eup %1467 }
 0x4b9   :  { %v1470_v20 = vpop.eup %1469  ;;  %354 = vrot.lane.b32.xlu1 %v1468_v19, %s1599_s1 }
 0x4ba   :  { %333 = vrot.lane.b32.xlu0 %v1470_v20, %s1599_s1 }
 0x52b   :  { %v355_v21 = vpop.permute.xlu1 %354 }
 0x52c   :  { %v357_v22 = vmul.f32 %v355_v21, %v340_v62  ;;  %v334_v23 = vpop.permute.xlu0 %333 }
 0x52d   :  { %v1783_v24 = vmul.f32 %v334_v23, %v319_v63 }
 0x52e   :  { %359 = vrot.lane.b32.xlu0 %v357_v22, %s1600_s2 }
 0x52f   :  { %363 = vrot.lane.b32.xlu1 %v1783_v24, %s1599_s1 }
 0x5a0   :  { %v360_v34 = vpop.permute.xlu0 %359 }
 0x5a1   :  { %v364_v37 = vpop.permute.xlu1 %363 }
 0x5a2   :  { %v366_v38 = vsel %vm233_vm4, %v360_v34, %v364_v37 }
 0x5a3   :  { %1284 = vmatmul.mubr.msk.f32.vlgmr.msra.gmra.mrb[8].mxu0 %vm235_vm5, %v366_v38 }
 0x5a4   :  { %1372 = vmatpush1.bf16.msra.mxu0 %v1687_v29  ;;  %684 = vmatprep.mubr.f32.mxu0 %v1601_v47 }
 0x5a5   :  { %1374 = vmatprep.subr.bf16.mxu0 %v1689_v30 }
 0x5a8   :  { %1376 = vmatpush1.bf16.msra.mxu0 %v1694_v35 }
 0x5a9   :  { %1378 = vmatprep.subr.bf16.mxu0 %v1698_v36 }
 0x5ac   :  { %1380 = vmatpush1.bf16.msra.mxu0 %v1702_v41 }
 0x5ad   :  { %1382 = vmatprep.subr.bf16.mxu0 %v1706_v42 }
 0x5b0   :  { %1384 = vmatpush1.bf16.msra.mxu0 %v1711_v46 }
 0x5b1   :  { %1402 = vmatprep.subr.bf16.mxu0 %v1685_v25 }
 0x676   :  { %v436_v40 = vpop.f32.mrb[8].mxu0 }
 0x677   :  { %v462_v43 = vadd.f32 %v436_v40, %v164_v39  ;;  %v438_v44 = vpop.f32.mrb[9].mxu0 }
 0x678   :  { %v441_v45 = vadd.f32 %v1738_v53, %v438_v44 }
 0x679   :  { %1471 = vtanh.f32 %v462_v43 }
 0x67a   :  { %1473 = vtanh.f32 %v441_v45 }
 0x683   :  { %v1472_v48 = vpop.eup %1471 }
 0x684   :  { %v1474_v49 = vpop.eup %1473  ;;  %v464_v50 = vmul.f32 %v1472_v48, %v1674_v12 }
 0x685   :  { %v443_v51 = vmul.f32 %v1474_v49, %v1674_v12 }
 0x686   :  { %v465_v52 = vadd.f32 %v464_v50, %v1676_v14 }
 0x687   :  { %v444_v54 = vadd.f32 %v443_v51, %v1676_v14 }
 0x688   :  { %468 = vrot.lane.b32.xlu1 %v465_v52, %s1599_s1  ;;  %v466_v59 = vmul.f32 %v465_v52, %v1750_v8 }
 0x689   :  { %447 = vrot.lane.b32.xlu0 %v444_v54, %s1599_s1  ;;  %v445_v61 = vmul.f32 %v444_v54, %v1752_v10 }
 0x6fa   :  { %v469_v55 = vpop.permute.xlu1 %468 }
 0x6fb   :  { %v471_v56 = vmul.f32 %v469_v55, %v465_v52  ;;  %v448_v57 = vpop.permute.xlu0 %447 }
 0x6fc   :  { %v450_v58 = vmul.f32 %v448_v57, %v444_v54 }
 0x6fd   :  { %473 = vrot.lane.b32.xlu1 %v471_v56, %s1600_s2 }
 0x6fe   :  { %452 = vrot.lane.b32.xlu0 %v450_v58, %s1600_s2  ;;  %v174_v58 = vadd.f32 %v1669_v6, %v1792_v31 }
 0x76f   :  { %v474_v60 = vpop.permute.xlu1 %473 }
 0x770   :  { %v476_v62 = vadd.f32 %v474_v60, %v466_v59  ;;  %v453_v63 = vpop.permute.xlu0 %452 }
 0x771   :  { %v455_v0 = vadd.f32 %v453_v63, %v445_v61 }
 0x772   :  { %1475 = vtanh.f32 %v476_v62 }
 0x773   :  { %1477 = vtanh.f32 %v455_v0 }
 0x77c   :  { %v1476_v1 = vpop.eup %1475 }
 0x77d   :  { %v1478_v2 = vpop.eup %1477  ;;  %479 = vrot.lane.b32.xlu1 %v1476_v1, %s1599_s1 }
 0x77e   :  { %458 = vrot.lane.b32.xlu0 %v1478_v2, %s1599_s1 }
 0x7ef   :  { %v480_v3 = vpop.permute.xlu1 %479 }
 0x7f0   :  { %v482_v4 = vmul.f32 %v480_v3, %v465_v52  ;;  %v459_v5 = vpop.permute.xlu0 %458 }
 0x7f1   :  { %v461_v7 = vmul.f32 %v459_v5, %v444_v54 }
 0x7f2   :  { %484 = vrot.lane.b32.xlu0 %v482_v4, %s1600_s2 }
 0x7f3   :  { %488 = vrot.lane.b32.xlu1 %v461_v7, %s1599_s1 }
 0x864   :  { %v485_v8 = vpop.permute.xlu0 %484 }
 0x865   :  { %v1825_v9 = vpop.permute.xlu1 %488 }
 0x866   :  { %v491_v10 = vsel %vm233_vm4, %v485_v8, %v1825_v9 }
 0x867   :  { %1285 = vmatmul.mubr.msk.f32.vlgmr.msra.gmra.mrb[2].mxu1 %vm235_vm5, %v491_v10 }
 0x868   :  { %1388 = vmatpush1.bf16.msra.mxu1 %v1687_v29  ;;  %809 = vmatprep.mubr.f32.mxu1 %v1601_v47 }
 0x869   :  { %1390 = vmatprep.subr.bf16.mxu1 %v1689_v30 }
 0x86c   :  { %1392 = vmatpush1.bf16.msra.mxu1 %v1694_v35 }
 0x86d   :  { %1394 = vmatprep.subr.bf16.mxu1 %v1698_v36 }
 0x870   :  { %1396 = vmatpush1.bf16.msra.mxu1 %v1702_v41 }
 0x871   :  { %1398 = vmatprep.subr.bf16.mxu1 %v1706_v42 }
 0x874   :  { %1400 = vmatpush1.bf16.msra.mxu1 %v1711_v46 }
 0x875   :  { %1418 = vmatprep.subr.bf16.mxu1 %v1685_v25 }
 0x93a   :  { %v561_v13 = vpop.f32.mrb[2].mxu1 }
 0x93b   :  { %v587_v15 = vadd.f32 %v561_v13, %v169_v11  ;;  %v563_v16 = vpop.f32.mrb[3].mxu1 }
 0x93c   :  { %v566_v17 = vadd.f32 %v1738_v53, %v563_v16 }
 0x93d   :  { %1479 = vtanh.f32 %v587_v15 }
 0x93e   :  { %1481 = vtanh.f32 %v566_v17 }
 0x947   :  { %v1480_v18 = vpop.eup %1479 }
 0x948   :  { %v1482_v19 = vpop.eup %1481  ;;  %v589_v20 = vmul.f32 %v1480_v18, %v1674_v12 }
 0x949   :  { %v568_v21 = vmul.f32 %v1482_v19, %v1674_v12 }
 0x94a   :  { %v590_v22 = vadd.f32 %v589_v20, %v1676_v14 }
 0x94b   :  { %v569_v23 = vadd.f32 %v568_v21, %v1676_v14 }
 0x94c   :  { %593 = vrot.lane.b32.xlu1 %v590_v22, %s1599_s1  ;;  %v591_v38 = vmul.f32 %v590_v22, %v476_v62 }
 0x94d   :  { %572 = vrot.lane.b32.xlu0 %v569_v23, %s1599_s1  ;;  %v570_v40 = vmul.f32 %v569_v23, %v455_v0 }
 0x9be   :  { %v594_v26 = vpop.permute.xlu1 %593 }
 0x9bf   :  { %v596_v27 = vmul.f32 %v594_v26, %v590_v22  ;;  %v573_v34 = vpop.permute.xlu0 %572 }
 0x9c0   :  { %v575_v37 = vmul.f32 %v573_v34, %v569_v23  ;;  %v179_v34 = vadd.f32 %v1790_v28, %v1669_v6 }
 0x9c1   :  { %598 = vrot.lane.b32.xlu1 %v596_v27, %s1600_s2 }
 0x9c2   :  { %577 = vrot.lane.b32.xlu0 %v575_v37, %s1600_s2 }
 0xa33   :  { %v599_v39 = vpop.permute.xlu1 %598 }
 0xa34   :  { %v601_v43 = vadd.f32 %v599_v39, %v591_v38  ;;  %v578_v44 = vpop.permute.xlu0 %577 }
 0xa35   :  { %v580_v45 = vadd.f32 %v578_v44, %v570_v40 }
 0xa36   :  { %1483 = vtanh.f32 %v601_v43 }
 0xa37   :  { %1485 = vtanh.f32 %v580_v45 }
 0xa40   :  { %v1484_v48 = vpop.eup %1483 }
 0xa41   :  { %v1486_v49 = vpop.eup %1485  ;;  %604 = vrot.lane.b32.xlu1 %v1484_v48, %s1599_s1 }
 0xa42   :  { %583 = vrot.lane.b32.xlu0 %v1486_v49, %s1599_s1 }
 0xab3   :  { %v605_v50 = vpop.permute.xlu1 %604 }
 0xab4   :  { %v607_v51 = vmul.f32 %v605_v50, %v590_v22  ;;  %v584_v52 = vpop.permute.xlu0 %583 }
 0xab5   :  { %v1852_v54 = vmul.f32 %v584_v52, %v569_v23 }
 0xab6   :  { %609 = vrot.lane.b32.xlu0 %v607_v51, %s1600_s2 }
 0xab7   :  { %613 = vrot.lane.b32.xlu1 %v1852_v54, %s1599_s1 }
 0xb28   :  { %v610_v55 = vpop.permute.xlu0 %609 }
 0xb29   :  { %v614_v56 = vpop.permute.xlu1 %613 }
 0xb2a   :  { %v616_v57 = vsel %vm233_vm4, %v610_v55, %v614_v56 }
 0xb2b   :  { %1286 = vmatmul.mubr.msk.f32.vlgmr.msra.gmra.mrb[10].mxu0 %vm235_vm5, %v616_v57 }
 0xb2c   :  { %1404 = vmatpush1.bf16.msra.mxu0 %v1687_v29  ;;  %934 = vmatprep.mubr.f32.mxu0 %v1601_v47 }
 0xb2d   :  { %1406 = vmatprep.subr.bf16.mxu0 %v1689_v30 }
 0xb30   :  { %1408 = vmatpush1.bf16.msra.mxu0 %v1694_v35 }
 0xb31   :  { %1410 = vmatprep.subr.bf16.mxu0 %v1698_v36 }
 0xb34   :  { %1412 = vmatpush1.bf16.msra.mxu0 %v1702_v41 }
 0xb35   :  { %1414 = vmatprep.subr.bf16.mxu0 %v1706_v42 }
 0xb38   :  { %1416 = vmatpush1.bf16.msra.mxu0 %v1711_v46 }
 0xb39   :  { %1434 = vmatprep.subr.bf16.mxu0 %v1685_v25 }
 0xbfe   :  { %v686_v59 = vpop.f32.mrb[10].mxu0 }
 0xbff   :  { %v712_v60 = vadd.f32 %v686_v59, %v174_v58  ;;  %v688_v61 = vpop.f32.mrb[11].mxu0 }
 0xc00   :  { %v691_v62 = vadd.f32 %v1738_v53, %v688_v61 }
 0xc01   :  { %1487 = vtanh.f32 %v712_v60 }
 0xc02   :  { %1489 = vtanh.f32 %v691_v62 }
 0xc0b   :  { %v1488_v63 = vpop.eup %1487 }
 0xc0c   :  { %v1490_v0 = vpop.eup %1489  ;;  %v714_v1 = vmul.f32 %v1488_v63, %v1674_v12 }
 0xc0d   :  { %v693_v2 = vmul.f32 %v1490_v0, %v1674_v12 }
 0xc0e   :  { %v715_v3 = vadd.f32 %v714_v1, %v1676_v14 }
 0xc0f   :  { %v694_v25 = vadd.f32 %v693_v2, %v1676_v14 }
 0xc10   :  { %718 = vrot.lane.b32.xlu1 %v715_v3, %s1599_s1  ;;  %v716_v8 = vmul.f32 %v715_v3, %v601_v43 }
 0xc11   :  { %697 = vrot.lane.b32.xlu0 %v694_v25, %s1599_s1  ;;  %v695_v11 = vmul.f32 %v694_v25, %v580_v45 }
 0xc82   :  { %v719_v31 = vpop.permute.xlu1 %718 }
 0xc83   :  { %v721_v4 = vmul.f32 %v719_v31, %v715_v3  ;;  %v698_v5 = vpop.permute.xlu0 %697 }
 0xc84   :  { %v700_v7 = vmul.f32 %v698_v5, %v694_v25  ;;  %v184_v5 = vadd.f32 %v1669_v6, %v1796_v33 }
 0xc85   :  { %723 = vrot.lane.b32.xlu1 %v721_v4, %s1600_s2 }
 0xc86   :  { %702 = vrot.lane.b32.xlu0 %v700_v7, %s1600_s2 }
 0xcf7   :  { %v724_v10 = vpop.permute.xlu1 %723 }
 0xcf8   :  { %v726_v13 = vadd.f32 %v724_v10, %v716_v8  ;;  %v703_v15 = vpop.permute.xlu0 %702 }
 0xcf9   :  { %v705_v16 = vadd.f32 %v703_v15, %v695_v11 }
 0xcfa   :  { %1491 = vtanh.f32 %v726_v13 }
 0xcfb   :  { %1493 = vtanh.f32 %v705_v16 }
 0xd04   :  { %v1492_v17 = vpop.eup %1491 }
 0xd05   :  { %v1494_v18 = vpop.eup %1493  ;;  %729 = vrot.lane.b32.xlu1 %v1492_v17, %s1599_s1 }
 0xd06   :  { %708 = vrot.lane.b32.xlu0 %v1494_v18, %s1599_s1 }
 0xd77   :  { %v730_v19 = vpop.permute.xlu1 %729 }
 0xd78   :  { %v732_v20 = vmul.f32 %v730_v19, %v715_v3  ;;  %v709_v21 = vpop.permute.xlu0 %708 }
 0xd79   :  { %v1881_v22 = vmul.f32 %v709_v21, %v694_v25 }
 0xd7a   :  { %734 = vrot.lane.b32.xlu0 %v732_v20, %s1600_s2 }
 0xd7b   :  { %738 = vrot.lane.b32.xlu1 %v1881_v22, %s1599_s1 }
 0xdec   :  { %v735_v23 = vpop.permute.xlu0 %734 }
 0xded   :  { %v739_v26 = vpop.permute.xlu1 %738 }
 0xdee   :  { %v741_v27 = vsel %vm233_vm4, %v735_v23, %v739_v26 }
 0xdef   :  { %1287 = vmatmul.mubr.msk.f32.vlgmr.msra.gmra.mrb[4].mxu1 %vm235_vm5, %v741_v27 }
 0xdf0   :  { %1420 = vmatpush1.bf16.msra.mxu1 %v1687_v29  ;;  %1059 = vmatprep.mubr.f32.mxu1 %v1601_v47 }
 0xdf1   :  { %1422 = vmatprep.subr.bf16.mxu1 %v1689_v30 }
 0xdf4   :  { %1424 = vmatpush1.bf16.msra.mxu1 %v1694_v35 }
 0xdf5   :  { %1426 = vmatprep.subr.bf16.mxu1 %v1698_v36 }
 0xdf8   :  { %1428 = vmatpush1.bf16.msra.mxu1 %v1702_v41 }
 0xdf9   :  { %1430 = vmatprep.subr.bf16.mxu1 %v1706_v42 }
 0xdfc   :  { %1432 = vmatpush1.bf16.msra.mxu1 %v1711_v46 }
 0xec2   :  { %v811_v37 = vpop.f32.mrb[4].mxu1 }
 0xec3   :  { %v837_v38 = vadd.f32 %v811_v37, %v179_v34  ;;  %v813_v39 = vpop.f32.mrb[5].mxu1 }
 0xec4   :  { %v816_v40 = vadd.f32 %v1738_v53, %v813_v39 }
 0xec5   :  { %1495 = vtanh.f32 %v837_v38 }
 0xec6   :  { %1497 = vtanh.f32 %v816_v40 }
 0xecf   :  { %v1496_v43 = vpop.eup %1495 }
 0xed0   :  { %v1498_v44 = vpop.eup %1497  ;;  %v839_v45 = vmul.f32 %v1496_v43, %v1674_v12  ;;  %v189_v43 = vadd.f32 %v1794_v32, %v1669_v6 }
 0xed1   :  { %v818_v48 = vmul.f32 %v1498_v44, %v1674_v12 }
 0xed2   :  { %v840_v49 = vadd.f32 %v839_v45, %v1676_v14 }
 0xed3   :  { %v819_v50 = vadd.f32 %v818_v48, %v1676_v14 }
 0xed4   :  { %843 = vrot.lane.b32.xlu1 %v840_v49, %s1599_s1  ;;  %v841_v56 = vmul.f32 %v840_v49, %v726_v13 }
 0xed5   :  { %822 = vrot.lane.b32.xlu0 %v819_v50, %s1599_s1  ;;  %v820_v58 = vmul.f32 %v819_v50, %v705_v16 }
 0xf46   :  { %v844_v28 = vpop.permute.xlu1 %843 }
 0xf47   :  { %v846_v51 = vmul.f32 %v844_v28, %v840_v49  ;;  %v823_v52 = vpop.permute.xlu0 %822 }
 0xf48   :  { %v825_v55 = vmul.f32 %v823_v52, %v819_v50 }
 0xf49   :  { %848 = vrot.lane.b32.xlu1 %v846_v51, %s1600_s2 }
 0xf4a   :  { %827 = vrot.lane.b32.xlu0 %v825_v55, %s1600_s2 }
 0xfbb   :  { %v849_v57 = vpop.permute.xlu1 %848 }
 0xfbc   :  { %v851_v59 = vadd.f32 %v849_v57, %v841_v56  ;;  %v828_v60 = vpop.permute.xlu0 %827 }
 0xfbd   :  { %v830_v61 = vadd.f32 %v828_v60, %v820_v58 }
 0xfbe   :  { %1499 = vtanh.f32 %v851_v59 }
 0xfbf   :  { %1501 = vtanh.f32 %v830_v61 }
 0xfc8   :  { %v1500_v62 = vpop.eup %1499 }
 0xfc9   :  { %v1502_v63 = vpop.eup %1501  ;;  %854 = vrot.lane.b32.xlu1 %v1500_v62, %s1599_s1 }
 0xfca   :  { %833 = vrot.lane.b32.xlu0 %v1502_v63, %s1599_s1 }
0x103b   :  { %v855_v0 = vpop.permute.xlu1 %854 }
0x103c   :  { %v857_v1 = vmul.f32 %v855_v0, %v840_v49  ;;  %v834_v2 = vpop.permute.xlu0 %833 }
0x103d   :  { %v1909_v3 = vmul.f32 %v834_v2, %v819_v50 }
0x103e   :  { %859 = vrot.lane.b32.xlu0 %v857_v1, %s1600_s2 }
0x103f   :  { %863 = vrot.lane.b32.xlu1 %v1909_v3, %s1599_s1 }
0x10b0   :  { %v860_v25 = vpop.permute.xlu0 %859 }
0x10b1   :  { %v864_v31 = vpop.permute.xlu1 %863 }
0x10b2   :  { %v866_v4 = vsel %vm233_vm4, %v860_v25, %v864_v31 }
0x10b3   :  { %1288 = vmatmul.mubr.msk.f32.vlgmr.msra.gmra.mrb[12].mxu0 %vm235_vm5, %v866_v4 }
0x10b4   :  { %1436 = vmatpush1.bf16.msra.mxu0 %v1687_v29  ;;  %1184 = vmatprep.mubr.f32.mxu0 %v1601_v47 }
0x10b5   :  { %1438 = vmatprep.subr.bf16.mxu0 %v1689_v30 }
0x10b8   :  { %1440 = vmatpush1.bf16.msra.mxu0 %v1694_v35 }
0x10b9   :  { %1442 = vmatprep.subr.bf16.mxu0 %v1698_v36 }
0x10bc   :  { %1444 = vmatpush1.bf16.msra.mxu0 %v1702_v41 }
0x10bd   :  { %1446 = vmatprep.subr.bf16.mxu0 %v1706_v42 }
0x10c0   :  { %1448 = vmatpush1.bf16.msra.mxu0 %v1711_v46 }
0x1186   :  { %v936_v7 = vpop.f32.mrb[12].mxu0 }
0x1187   :  { %v962_v8 = vadd.f32 %v936_v7, %v184_v5  ;;  %v938_v29 = vpop.f32.mrb[13].mxu0 }
0x1188   :  { %v941_v47 = vadd.f32 %v1738_v53, %v938_v29 }
0x1189   :  { %1503 = vtanh.f32 %v962_v8 }
0x118a   :  { %1505 = vtanh.f32 %v941_v47 }
0x1193   :  { %v1504_v30 = vpop.eup %1503 }
0x1194   :  { %v1506_v35 = vpop.eup %1505  ;;  %v964_v36 = vmul.f32 %v1504_v30, %v1674_v12 }
0x1195   :  { %v943_v41 = vmul.f32 %v1506_v35, %v1674_v12 }
0x1196   :  { %v965_v42 = vadd.f32 %v964_v36, %v1676_v14 }
0x1197   :  { %v944_v46 = vadd.f32 %v943_v41, %v1676_v14 }
0x1198   :  { %968 = vrot.lane.b32.xlu1 %v965_v42, %s1599_s1  ;;  %v966_v15 = vmul.f32 %v965_v42, %v851_v59 }
0x1199   :  { %947 = vrot.lane.b32.xlu0 %v944_v46, %s1599_s1  ;;  %v945_v17 = vmul.f32 %v944_v46, %v830_v61 }
0x120a   :  { %v969_v33 = vpop.permute.xlu1 %968 }
0x120b   :  { %v971_v10 = vmul.f32 %v969_v33, %v965_v42  ;;  %v948_v11 = vpop.permute.xlu0 %947 }
0x120c   :  { %v950_v13 = vmul.f32 %v948_v11, %v944_v46 }
0x120d   :  { %973 = vrot.lane.b32.xlu1 %v971_v10, %s1600_s2 }
0x120e   :  { %952 = vrot.lane.b32.xlu0 %v950_v13, %s1600_s2 }
0x127f   :  { %v974_v16 = vpop.permute.xlu1 %973 }
0x1280   :  { %v976_v18 = vadd.f32 %v974_v16, %v966_v15  ;;  %v953_v19 = vpop.permute.xlu0 %952 }
0x1281   :  { %v955_v20 = vadd.f32 %v953_v19, %v945_v17 }
0x1282   :  { %1507 = vtanh.f32 %v976_v18 }
0x1283   :  { %1509 = vtanh.f32 %v955_v20 }
0x128c   :  { %v1508_v21 = vpop.eup %1507 }
0x128d   :  { %v1510_v23 = vpop.eup %1509  ;;  %979 = vrot.lane.b32.xlu1 %v1508_v21, %s1599_s1 }
0x128e   :  { %958 = vrot.lane.b32.xlu0 %v1510_v23, %s1599_s1 }
0x12ff   :  { %v980_v26 = vpop.permute.xlu1 %979 }
0x1300   :  { %v982_v27 = vmul.f32 %v980_v26, %v965_v42  ;;  %v959_v34 = vpop.permute.xlu0 %958 }
0x1301   :  { %v961_v37 = vmul.f32 %v959_v34, %v944_v46 }
0x1302   :  { %984 = vrot.lane.b32.xlu0 %v982_v27, %s1600_s2 }
0x1303   :  { %988 = vrot.lane.b32.xlu1 %v961_v37, %s1599_s1 }
0x1374   :  { %v985_v38 = vpop.permute.xlu0 %984 }
0x1375   :  { %v1939_v39 = vpop.permute.xlu1 %988 }
0x1376   :  { %v991_v40 = vsel %vm233_vm4, %v985_v38, %v1939_v39 }
0x1377   :  { %1289 = vmatmul.mubr.msk.f32.vlgmr.msra.gmra.mrb[6].mxu1 %vm235_vm5, %v991_v40 }
0x144a   :  { %v1061_v44 = vpop.f32.mrb[6].mxu1 }
0x144b   :  { %v1087_v45 = vadd.f32 %v1061_v44, %v189_v43  ;;  %v1063_v48 = vpop.f32.mrb[7].mxu1 }
0x144c   :  { %v1066_v49 = vadd.f32 %v1738_v53, %v1063_v48 }
0x144d   :  { %1511 = vtanh.f32 %v1087_v45 }
0x144e   :  { %1513 = vtanh.f32 %v1066_v49 }
0x1457   :  { %v1512_v50 = vpop.eup %1511 }
0x1458   :  { %v1514_v28 = vpop.eup %1513  ;;  %v1089_v51 = vmul.f32 %v1512_v50, %v1674_v12 }
0x1459   :  { %v1068_v52 = vmul.f32 %v1514_v28, %v1674_v12 }
0x145a   :  { %v1090_v55 = vadd.f32 %v1089_v51, %v1676_v14 }
0x145b   :  { %v1069_v56 = vadd.f32 %v1068_v52, %v1676_v14 }
0x145c   :  { %1093 = vrot.lane.b32.xlu1 %v1090_v55, %s1599_s1  ;;  %v1091_v59 = vmul.f32 %v1090_v55, %v976_v18 }
0x145d   :  { %1072 = vrot.lane.b32.xlu0 %v1069_v56, %s1599_s1  ;;  %v1070_v61 = vmul.f32 %v1069_v56, %v955_v20 }
0x14ce   :  { %v1094_v6 = vpop.permute.xlu1 %1093 }
0x14cf   :  { %v1096_v32 = vmul.f32 %v1094_v6, %v1090_v55  ;;  %v1073_v57 = vpop.permute.xlu0 %1072 }
0x14d0   :  { %v1075_v58 = vmul.f32 %v1073_v57, %v1069_v56 }
0x14d1   :  { %1098 = vrot.lane.b32.xlu1 %v1096_v32, %s1600_s2 }
0x14d2   :  { %1077 = vrot.lane.b32.xlu0 %v1075_v58, %s1600_s2 }
0x1543   :  { %v1099_v60 = vpop.permute.xlu1 %1098 }
0x1544   :  { %v1955_v62 = vadd.f32 %v1099_v60, %v1091_v59  ;;  %v1078_v63 = vpop.permute.xlu0 %1077 }
0x1545   :  { %v1080_v0 = vadd.f32 %v1078_v63, %v1070_v61 }
0x1546   :  { %1515 = vtanh.f32 %v1955_v62 }
0x1547   :  { %1517 = vtanh.f32 %v1080_v0 }
0x1550   :  { %v1516_v1 = vpop.eup %1515 }
0x1551   :  { %v1518_v2 = vpop.eup %1517  ;;  %1104 = vrot.lane.b32.xlu1 %v1516_v1, %s1599_s1 }
0x1552   :  { %1083 = vrot.lane.b32.xlu0 %v1518_v2, %s1599_s1 }
0x15c3   :  { %v1105_v25 = vpop.permute.xlu1 %1104 }
0x15c4   :  { %v1107_v31 = vmul.f32 %v1105_v25, %v1090_v55  ;;  %v1084_v4 = vpop.permute.xlu0 %1083 }
0x15c5   :  { %v1086_v5 = vmul.f32 %v1084_v4, %v1069_v56 }
0x15c6   :  { %1109 = vrot.lane.b32.xlu0 %v1107_v31, %s1600_s2 }
0x15c7   :  { %1113 = vrot.lane.b32.xlu1 %v1086_v5, %s1599_s1 }
0x1638   :  { %v1110_v7 = vpop.permute.xlu0 %1109 }
0x1639   :  { %v1114_v8 = vpop.permute.xlu1 %1113 }
0x163a   :  { %v1116_v29 = vsel %vm233_vm4, %v1110_v7, %v1114_v8 }
0x163b   :  { %1290 = vmatmul.mubr.msk.f32.vlgmr.msra.gmra.mrb[14].mxu0 %vm235_vm5, %v1116_v29 }
0x170e   :  { %v1186_v47 = vpop.f32.mrb[14].mxu0 }
0x170f   :  { %v1187_v30 = vpop.f32.mrb[15].mxu0 }
0x1710   :  { %v1190_v35 = vadd.f32 %v1738_v53, %v1187_v30 }
0x1712   :  { %1519 = vtanh.f32 %v1190_v35 }
0x171c   :  { %v1520_v36 = vpop.eup %1519 }
0x171d   :  { %v1192_v41 = vmul.f32 %v1520_v36, %v1674_v12 }
0x171f   :  { %v1193_v42 = vadd.f32 %v1192_v41, %v1676_v14 }
0x1721   :  { %1196 = vrot.lane.b32.xlu0 %v1193_v42, %s1599_s1  ;;  %v1194_v10 = vmul.f32 %v1193_v42, %v1080_v0 }
0x1793   :  { %v1197_v46 = vpop.permute.xlu0 %1196 }
0x1794   :  { %v1199_v33 = vmul.f32 %v1197_v46, %v1193_v42 }
0x1796   :  { %1201 = vrot.lane.b32.xlu1 %v1199_v33, %s1600_s2 }
0x179a   :  { %1211 = vrot.lane.b32.xlu1 %v1783_v24, %s1600_s2 }
0x179e   :  { %1214 = vrot.lane.b32.xlu1 %v1852_v54, %s1602_s0 }
0x1808   :  { %v1202_v53 = vpop.permute.xlu1 %1201 }
0x1809   :  { %v1204_v11 = vadd.f32 %v1202_v53, %v1194_v10 }
0x180b   :  { %1521 = vtanh.f32 %v1204_v11 }
0x180c   :  { %v1212_v13 = vpop.permute.xlu1 %1211 }
0x180d   :  { %v1223_v12 = vsel %vm233_vm4, %v1212_v13, %v1825_v9 }
0x1810   :  { %v1215_v14 = vpop.permute.xlu1 %1214 }
0x1811   :  { %v1224_v15 = vsel %vm235_vm5, %v1223_v12, %v1215_v14 }
0x1812   :  { %v1226_v16 = vsel %vm1225_vm6, %v1224_v15, %v1881_v22 }
0x1813   :  { %1230 = vst [vmem:[#allocation5] sm:$0xff] %v1226_v16 }
0x1815   :  { %v1522_v24 = vpop.eup %1521 }
0x1816   :  { %1207 = vrot.lane.b32.xlu0 %v1522_v24, %s1599_s1 }
0x181a   :  { %1217 = vrot.lane.b32.xlu0 %v1909_v3, %s1600_s2 }
0x181e   :  { %1220 = vrot.lane.b32.xlu0 %v1086_v5, %s1602_s0 }
0x1822   :  { %1237 = vrot.lane.b32.xlu0 %v1204_v11, %s1599_s1 }
0x1888   :  { %v1208_v54 = vpop.permute.xlu0 %1207 }
0x1889   :  { %v1210_v17 = vmul.f32 %v1208_v54, %v1193_v42 }
0x188b   :  { %1233 = vrot.lane.b32.xlu1 %v1210_v17, %s1602_s0 }
0x188c   :  { %v1218_v9 = vpop.permute.xlu0 %1217 }
0x188d   :  { %v1227_v18 = vsel %vm233_vm4, %v1218_v9, %v1939_v39 }
0x1890   :  { %v1221_v22 = vpop.permute.xlu0 %1220 }
0x1891   :  { %v1228_v19 = vsel %vm235_vm5, %v1227_v18, %v1221_v22 }
0x1892   :  { %v1229_v20 = vsel %vm1225_vm6, %v1228_v19, %v1210_v17 }
0x1893   :  { %1231 = vst [vmem:[#allocation5 + $0x8] sm:$0xff] %v1229_v20 }
0x1894   :  { %1556 = shalt.err (!%p1553_p12)
}
0x1895   :  { %s1557_s14 = scalar_lea.hbm %s2018_s5, 256 }
0x1896   :  { %p1558_p13 = scmp.ne.s32.totalorder %s2018_s5, %s1557_s14  ;;  %p1561_p0 = scmp.lt.u32.totalorder %s1557_s14, %s2018_s5 }
0x1898   :  { %p1563_p1 = pnand %p1561_p0, %p1558_p13 }
0x189a   :  { %1566 = shalt.err (!%p1563_p1)
}
0x189b   :  { %1253 = dma.vmem_to_hbm [thread:$0]  %s1251_s10, 256, %s2018_s5, [#allocation4]   ;;  %v1240_v3 = vsel %vm233_vm4, %v1110_v7, %v1955_v62  ;;  %v1238_v23 = vpop.permute.xlu0 %1237 }
0x189c   :  { %s1604_s1 = smov [#allocation6]  }
0x189d   :  { %s1260_s2 = sshll.u32 %s1604_s1, 4  ;;  %s1261_s2 = int_to_ptr.vmem [resolvable:$true] %s1260_s2 }
0x189e   :  { %s1567_s20 = scalar_lea.vmem %s1261_s2, 128  ;;  %p1572_p3 = scmp.lt.s32.totalorder %s1261_s2, %s1261_s2 }
0x189f   :  { %p1568_p2 = scmp.ne.s32.totalorder %s1261_s2, %s1567_s20  ;;  %p1573_p4 = scmp.lt.s32.totalorder %s1567_s20, %s1567_s20 }
0x18a1   :  { %p1574_p5 = por %p1573_p4, %p1572_p3 }
0x18a3   :  { %p1575_p6 = pnand %p1574_p5, %p1568_p2 }
0x18fd   :  { %v1234_v21 = vpop.permute.xlu1 %1233 }
0x18fe   :  { %v1241_v26 = vsel %vm235_vm5, %v1240_v3, %v1234_v21 }
0x18ff   :  { %v1242_v27 = vsel %vm1225_vm6, %v1241_v26, %v1238_v23 }
0x1900   :  { %1243 = vst [vmem:[#allocation6] sm:$0xff] %v1242_v27 }
0x1901   :  { %1578 = shalt.err (!%p1575_p6)
}
0x1902   :  { %s1579_s4 = scalar_lea.hbm %s2019_s6, 128 }
0x1903   :  { %p1580_p7 = scmp.ne.s32.totalorder %s2019_s6, %s1579_s4  ;;  %p1583_p8 = scmp.lt.u32.totalorder %s1579_s4, %s2019_s6 }
0x1905   :  { %p1585_p9 = pnand %p1583_p8, %p1580_p7 }
0x1907   :  { %1588 = shalt.err (!%p1585_p9)
}
0x1908   :  { %1263 = dma.vmem_to_hbm [thread:$0]  %s1261_s2, 128, %s2019_s6, [#allocation7]  }
0x1909   :  { %1591 = dma.done.wait [#allocation4], 256  }
0x190a   :  { %1592 = vsyncadd [#allocation4], 4294967040 }
0x190b   :  { %1593 = dma.done.wait [#allocation7], 128  }
0x190c   :  { %1594 = vsyncadd [#allocation7], 4294967168 }
0x190d   :  { %1270 = vsyncpa [#allocation3], 1 }
0x190e   :  { %1271 = vsyncpa [#allocation4], 1 }
0x190f   :  { %1272 = vsyncpa [#allocation7], 1 }

</bundles_post_ra>
